<compile_context>
chip_gen: v7x
topology: tpu7x:2x2x1
jax: 0.10.0
libtpu: 0.0.40
codegen_flags: <defaults>
</compile_context>

<pallas_src>
import functools
import math

import jax
import jax.numpy as jnp
import numpy as np
from jax import lax
from jax.experimental import pallas as pl
from jax.experimental.pallas import tpu as pltpu


def _round_up(x, m):
    return ((x + m - 1) // m) * m


def _lcm(a, b):
    return a * b // math.gcd(a, b)


# --------------------------------------------------------------------------- #
# Kernel
# --------------------------------------------------------------------------- #
def dpbl_embed_kernel(ids_ref, table_ref, pe_ref, out_ref, *,
                      time_embed_num, pack, e_pad):
    """Fused lookup: out = TimeEmb + EventEmb + PosEmb, `pack` tokens per output row.

    ids_ref:   (2*pack, G) int32   rows [time_0..P-1 | event_0..P-1 (pre-offset by +Vt)],
                                   lane-dense along G
    table_ref: (K, e_pad)  f32     combined [time_table; event_table; zero pad]
    pe_ref:    (G, pack*e_pad) f32 lane-packed positional-embedding slab for this tile
    out_ref:   (G, pack*e_pad) f32 `pack` tokens packed per 128-lane output row
    """
    K = table_ref.shape[0]
    # (K, 1) iota; broadcasting happens inside the compares (never materialized at (K, G)).
    k_iota = lax.broadcasted_iota(jnp.int32, (K, 1), 0)

    for j in range(pack):                                  # static; pack = 128 // e_pad
        t_ids = ids_ref[pl.ds(j, 1), :]                    # (1, G) raw time ids
        e_ids = ids_ref[pl.ds(pack + j, 1), :]             # (1, G) event ids (+Vt offset)
        t_ids = jnp.minimum(t_ids, time_embed_num)         # data['time'][t > n] = n
        # Transposed one-hot (K, G): K in sublanes, G in lanes, so the (1, G) id rows are
        # used as-is (no transpose needed) and the ids DMA stays lane-dense.
        # NOTE: out-of-range / negative ids silently select a zero (or aliased) row,
        # unlike nn.Embedding which would raise.
        oh = ((k_iota == t_ids) | (k_iota == e_ids)).astype(jnp.float32)
        # One MXU matmul per packed slot: oh^T @ table -> (G, e_pad).  HIGHEST precision
        # keeps the f32 result exact (one-hot entries are 0/1).
        blk = lax.dot_general(
            oh, table_ref[...],
            dimension_numbers=(((0,), (0,)), ((), ())),
            preferred_element_type=jnp.float32,
            precision=lax.Precision.HIGHEST)
        cols = pl.ds(j * e_pad, e_pad)
        out_ref[:, cols] = blk + pe_ref[:, cols]           # fused positional add + store


# --------------------------------------------------------------------------- #
# Builder / wrapper
# --------------------------------------------------------------------------- #
def make_positional_table(max_len, d_model):
    """Standard sinusoidal PE buffer, identical to PositionalEmbedding.__init__."""
    position = jnp.arange(max_len, dtype=jnp.float32)[:, None]
    div_term = jnp.exp(jnp.arange(0, d_model, 2, dtype=jnp.float32)
                       * (-math.log(10000.0) / d_model))
    pe = jnp.zeros((max_len, d_model), jnp.float32)
    pe = pe.at[:, 0::2].set(jnp.sin(position * div_term))
    pe = pe.at[:, 1::2].set(jnp.cos(position * div_term))
    return pe


def build_dpbl_embedding(time_table, event_table, pe_table, *, time_embed_num,
                         batch, seq_len, max_tile_rows=2048):
    """Precomputes static tables/specs once; returns a jitted forward(time_ids, event_ids)."""
    B, S = batch, seq_len
    Vt, E = time_table.shape
    Ve, E2 = event_table.shape
    assert E == E2 and pe_table.shape[0] >= S and pe_table.shape[1] == E

    # ---- packing geometry: P tokens packed per 128-lane output row -------------------
    if E % 128 == 0:
        e_pad, P = E, 1
    elif E < 128:
        e_pad = 1 << (E - 1).bit_length()          # next pow2 >= E (divides 128)
        P = 128 // e_pad
    else:
        e_pad, P = _round_up(E, 128), 1
    S_pad = _round_up(S, P)
    rows_per_seq = S_pad // P                      # PE pattern repeats every rows_per_seq rows
    G_total = B * rows_per_seq

    # ---- combined [time; event] lookup table (small; no block-diagonal copy) ---------
    K_pad = _round_up(Vt + Ve, 8)
    table = jnp.zeros((K_pad, e_pad), jnp.float32)
    table = table.at[:Vt, :E].set(time_table.astype(jnp.float32))
    table = table.at[Vt:Vt + Ve, :E].set(event_table.astype(jnp.float32))

    # ---- tile size: multiple of 128 (lane-dense ids blocks), aim for >= 8 grid steps
    # on big inputs (v7x megacore), cap so the per-tile VMEM footprint stays small -----
    unit_pe = _lcm(rows_per_seq, 128)
    pe_resident = unit_pe <= 4096                  # keep PE slab VMEM-resident when cheap
    unit = unit_pe if pe_resident else 128
    vmem_rows = max(unit, (3 << 20) // (4 * max(K_pad, 64)))   # bound one-hot intermediates
    G_tile = min(max(pl.cdiv(G_total, 8), 1), max_tile_rows, vmem_rows)
    G_tile = _round_up(G_tile, unit)
    G_pad = _round_up(G_total, G_tile)
    n_steps = G_pad // G_tile

    # ---- lane-packed positional-embedding slab ---------------------------------------
    pe_rows = jnp.zeros((S_pad, e_pad), jnp.float32)
    pe_rows = pe_rows.at[:S, :E].set(pe_table[:S].astype(jnp.float32))
    pe_rows = pe_rows.reshape(rows_per_seq, P * e_pad)
    if pe_resident:
        # G_tile % rows_per_seq == 0, so one (G_tile, 128) slab serves every grid step.
        pe_slab = jnp.tile(pe_rows, (G_tile // rows_per_seq, 1))
        pe_spec = pl.BlockSpec((G_tile, P * e_pad), lambda i: (0, 0))
    else:
        # Fallback for huge/awkward sequence lengths: stream the PE rows per tile.
        reps = pl.cdiv(G_pad, rows_per_seq)
        pe_slab = jnp.tile(pe_rows, (reps, 1))[:G_pad]
        pe_spec = pl.BlockSpec((G_tile, P * e_pad), lambda i: (i, 0))

    kernel = functools.partial(dpbl_embed_kernel, time_embed_num=time_embed_num,
                               pack=P, e_pad=e_pad)

    call = pl.pallas_call(
        kernel,
        out_shape=jax.ShapeDtypeStruct((G_pad, P * e_pad), jnp.float32),
        grid_spec=pltpu.PrefetchScalarGridSpec(
            num_scalar_prefetch=0,
            grid=(n_steps,),
            in_specs=[
                pl.BlockSpec((2 * P, G_tile), lambda i: (0, i)),    # ids, lane-dense in G
                pl.BlockSpec((K_pad, e_pad), lambda i: (0, 0)),     # combined table (resident)
                pe_spec,                                            # PE slab
            ],
            out_specs=pl.BlockSpec((G_tile, P * e_pad), lambda i: (i, 0)),
        ),
        compiler_params=pltpu.CompilerParams(dimension_semantics=("parallel",)),
    )

    def forward(time_ids, event_ids):
        # Per-call work is only integer-id packing; everything heavy lives in the kernel.
        t = time_ids.astype(jnp.int32)
        e = event_ids.astype(jnp.int32) + Vt           # offset into the combined table
        if S_pad != S:
            pad = ((0, 0), (0, S_pad - S))
            t = jnp.pad(t, pad)
            e = jnp.pad(e, pad)
        ids = jnp.concatenate([t.reshape(G_total, P).T,
                               e.reshape(G_total, P).T], axis=0)    # (2P, G_total)
        if G_pad != G_total:
            ids = jnp.pad(ids, ((0, 0), (0, G_pad - G_total)))      # pad rows -> sliced off
        out = call(ids, table, pe_slab)                             # (G_pad, P*e_pad)
        # TODO(synk): train-mode dropout (p=0.1) not implemented; eval dropout == identity.
        out = out[:G_total].reshape(B, rows_per_seq, P, e_pad).reshape(B, S_pad, e_pad)
        return out[:, :S, :E]

    return jax.jit(forward)


# --------------------------------------------------------------------------- #
# Pure-JAX reference for verification
# --------------------------------------------------------------------------- #
def ref_forward(time_ids, event_ids, time_table, event_table, pe_table, time_embed_num):
    t = jnp.where(time_ids > time_embed_num, time_embed_num, time_ids)
    t_emb = time_table[t]             # (B, S, E)
    e_emb = event_table[event_ids]    # (B, S, E)
    pe = pe_table[:time_ids.shape[1]]
    return t_emb + e_emb + pe[None]


if __name__ == "__main__":
    # config consistent with the module's __init__
    config = {"time_embed_num": 12, "max_event_num": 13, "max_len": 14}
    embed_size = 32
    B, S = 2, 8

    Vt = config["time_embed_num"] + 4        # 16, padding_idx = time_embed_num + 2
    Ve = config["max_event_num"] + 3         # 16, padding_idx = max_event_num + 2
    pad_t = config["time_embed_num"] + 2
    pad_e = config["max_event_num"] + 2

    key = jax.random.PRNGKey(0)
    k1, k2, k3, k4 = jax.random.split(key, 4)

    # deterministic parameter init (nn.Embedding default ~ N(0,1), padding row zeroed)
    time_table = jax.random.normal(k1, (Vt, embed_size), dtype=jnp.float32)
    time_table = time_table.at[pad_t].set(0.0)
    event_table = jax.random.normal(k2, (Ve, embed_size), dtype=jnp.float32)
    event_table = event_table.at[pad_e].set(0.0)

    # fixed sinusoidal PE buffer (built once, as in PositionalEmbedding.__init__)
    pe_table = make_positional_table(config["max_len"] + 2, embed_size)

    # integer inputs; time includes values > time_embed_num to exercise the clamp
    time_ids = jax.random.randint(k3, (B, S), 0, Vt, dtype=jnp.int32)
    event_ids = jax.random.randint(k4, (B, S), 0, Ve, dtype=jnp.int32)

    fwd = build_dpbl_embedding(time_table, event_table, pe_table,
                               time_embed_num=config["time_embed_num"],
                               batch=B, seq_len=S)
    out = jax.block_until_ready(fwd(time_ids, event_ids))

    ref = ref_forward(time_ids, event_ids, time_table, event_table, pe_table,
                      config["time_embed_num"])
    np.testing.assert_allclose(np.asarray(out), np.asarray(ref), rtol=1e-5, atol=1e-5)

    print("KERNEL_OK")
</pallas_src>

<mosaic_0001>
module attributes {stable_mosaic.version = 11 : i64} {
  func.func @dpbl_embed_kernel(%arg0: i32, %arg1: memref<8x128xi32, #tpu.memory_space<vmem>>, %arg2: memref<32x32xf32, #tpu.memory_space<vmem>>, %arg3: memref<128x128xf32, #tpu.memory_space<vmem>>, %arg4: memref<128x128xf32, #tpu.memory_space<vmem>>) attributes {dimension_semantics = [#tpu.dimension_semantics<parallel>], iteration_bounds = array<i64: 1>, scalar_prefetch = 0 : i64, scratch_operands = 0 : i64, tpu.core_type = #tpu.core_type<tc>, window_params = [{transform_indices = @transform_0, window_bounds = array<i64: 8, 128>}, {pipeline_mode = #tpu.pipeline_mode<synchronous>, transform_indices = @transform_1, window_bounds = array<i64: 32, 32>}, {pipeline_mode = #tpu.pipeline_mode<synchronous>, transform_indices = @transform_2, window_bounds = array<i64: 128, 128>}, {transform_indices = @transform_3, window_bounds = array<i64: 128, 128>}]} {
    %0 = tpu.iota {dimensions = array<i32: 0>} : vector<32x1xi32>
    %c0 = arith.constant 0 : index
    %c0_0 = arith.constant 0 : index
    %1 = vector.load %arg1[%c0, %c0_0] : memref<8x128xi32, #tpu.memory_space<vmem>>, vector<1x128xi32>
    %c4 = arith.constant 4 : index
    %c0_1 = arith.constant 0 : index
    %2 = vector.load %arg1[%c4, %c0_1] : memref<8x128xi32, #tpu.memory_space<vmem>>, vector<1x128xi32>
    %c12_i32 = arith.constant 12 : i32
    %3 = vector.broadcast %c12_i32 : i32 to vector<1x128xi32>
    %4 = arith.minsi %1, %3 : vector<1x128xi32>
    %5 = vector.broadcast %0 : vector<32x1xi32> to vector<32x128xi32>
    %6 = vector.broadcast %4 : vector<1x128xi32> to vector<32x128xi32>
    %7 = arith.cmpi eq, %5, %6 : vector<32x128xi32>
    %8 = vector.broadcast %0 : vector<32x1xi32> to vector<32x128xi32>
    %9 = vector.broadcast %2 : vector<1x128xi32> to vector<32x128xi32>
    %10 = arith.cmpi eq, %8, %9 : vector<32x128xi32>
    %11 = arith.ori %7, %10 : vector<32x128xi1>
    %12 = arith.extui %11 : vector<32x128xi1> to vector<32x128xi32>
    %13 = arith.sitofp %12 : vector<32x128xi32> to vector<32x128xf32>
    %c0_2 = arith.constant 0 : index
    %c0_3 = arith.constant 0 : index
    %14 = vector.load %arg2[%c0_2, %c0_3] : memref<32x32xf32, #tpu.memory_space<vmem>>, vector<32x32xf32>
    %cst = arith.constant dense<0.000000e+00> : vector<128x32xf32>
    %15 = tpu.matmul %13, %14, %cst {dimension_numbers = #tpu.dot_dimension_numbers<[0], [0], [1], [1], [0, 1, 1, 1], [], []>, precision = #tpu.contract_precision<fp32>} : vector<32x128xf32>, vector<32x32xf32>, vector<128x32xf32> -> vector<128x32xf32>
    %c0_4 = arith.constant 0 : index
    %c0_5 = arith.constant 0 : index
    %16 = vector.load %arg3[%c0_4, %c0_5] : memref<128x128xf32, #tpu.memory_space<vmem>>, vector<128x32xf32>
    %17 = arith.addf %15, %16 : vector<128x32xf32>
    %c0_6 = arith.constant 0 : index
    %c0_7 = arith.constant 0 : index
    %18 = vector.load %arg4[%c0_6, %c0_7] : memref<128x128xf32, #tpu.memory_space<vmem>>, vector<128x32xf32>
    tpu.vector_store %arg4[%c0_6, %c0_7], %17 {strides = array<i32>} : memref<128x128xf32, #tpu.memory_space<vmem>>, vector<128x32xf32>,
    %c1 = arith.constant 1 : index
    %c0_8 = arith.constant 0 : index
    %19 = vector.load %arg1[%c1, %c0_8] : memref<8x128xi32, #tpu.memory_space<vmem>>, vector<1x128xi32>
    %c5 = arith.constant 5 : index
    %c0_9 = arith.constant 0 : index
    %20 = vector.load %arg1[%c5, %c0_9] : memref<8x128xi32, #tpu.memory_space<vmem>>, vector<1x128xi32>
    %c12_i32_10 = arith.constant 12 : i32
    %21 = vector.broadcast %c12_i32_10 : i32 to vector<1x128xi32>
    %22 = arith.minsi %19, %21 : vector<1x128xi32>
    %23 = vector.broadcast %0 : vector<32x1xi32> to vector<32x128xi32>
    %24 = vector.broadcast %22 : vector<1x128xi32> to vector<32x128xi32>
    %25 = arith.cmpi eq, %23, %24 : vector<32x128xi32>
    %26 = vector.broadcast %0 : vector<32x1xi32> to vector<32x128xi32>
    %27 = vector.broadcast %20 : vector<1x128xi32> to vector<32x128xi32>
    %28 = arith.cmpi eq, %26, %27 : vector<32x128xi32>
    %29 = arith.ori %25, %28 : vector<32x128xi1>
    %30 = arith.extui %29 : vector<32x128xi1> to vector<32x128xi32>
    %31 = arith.sitofp %30 : vector<32x128xi32> to vector<32x128xf32>
    %c0_11 = arith.constant 0 : index
    %c0_12 = arith.constant 0 : index
    %32 = vector.load %arg2[%c0_11, %c0_12] : memref<32x32xf32, #tpu.memory_space<vmem>>, vector<32x32xf32>
    %cst_13 = arith.constant dense<0.000000e+00> : vector<128x32xf32>
    %33 = tpu.matmul %31, %32, %cst_13 {dimension_numbers = #tpu.dot_dimension_numbers<[0], [0], [1], [1], [0, 1, 1, 1], [], []>, precision = #tpu.contract_precision<fp32>} : vector<32x128xf32>, vector<32x32xf32>, vector<128x32xf32> -> vector<128x32xf32>
    %c0_14 = arith.constant 0 : index
    %c32 = arith.constant 32 : index
    %34 = vector.load %arg3[%c0_14, %c32] : memref<128x128xf32, #tpu.memory_space<vmem>>, vector<128x32xf32>
    %35 = arith.addf %33, %34 : vector<128x32xf32>
    %c0_15 = arith.constant 0 : index
    %c32_16 = arith.constant 32 : index
    %36 = vector.load %arg4[%c0_15, %c32_16] : memref<128x128xf32, #tpu.memory_space<vmem>>, vector<128x32xf32>
    tpu.vector_store %arg4[%c0_15, %c32_16], %35 {strides = array<i32>} : memref<128x128xf32, #tpu.memory_space<vmem>>, vector<128x32xf32>,
    %c2 = arith.constant 2 : index
    %c0_17 = arith.constant 0 : index
    %37 = vector.load %arg1[%c2, %c0_17] : memref<8x128xi32, #tpu.memory_space<vmem>>, vector<1x128xi32>
    %c6 = arith.constant 6 : index
    %c0_18 = arith.constant 0 : index
    %38 = vector.load %arg1[%c6, %c0_18] : memref<8x128xi32, #tpu.memory_space<vmem>>, vector<1x128xi32>
    %c12_i32_19 = arith.constant 12 : i32
    %39 = vector.broadcast %c12_i32_19 : i32 to vector<1x128xi32>
    %40 = arith.minsi %37, %39 : vector<1x128xi32>
    %41 = vector.broadcast %0 : vector<32x1xi32> to vector<32x128xi32>
    %42 = vector.broadcast %40 : vector<1x128xi32> to vector<32x128xi32>
    %43 = arith.cmpi eq, %41, %42 : vector<32x128xi32>
    %44 = vector.broadcast %0 : vector<32x1xi32> to vector<32x128xi32>
    %45 = vector.broadcast %38 : vector<1x128xi32> to vector<32x128xi32>
    %46 = arith.cmpi eq, %44, %45 : vector<32x128xi32>
    %47 = arith.ori %43, %46 : vector<32x128xi1>
    %48 = arith.extui %47 : vector<32x128xi1> to vector<32x128xi32>
    %49 = arith.sitofp %48 : vector<32x128xi32> to vector<32x128xf32>
    %c0_20 = arith.constant 0 : index
    %c0_21 = arith.constant 0 : index
    %50 = vector.load %arg2[%c0_20, %c0_21] : memref<32x32xf32, #tpu.memory_space<vmem>>, vector<32x32xf32>
    %cst_22 = arith.constant dense<0.000000e+00> : vector<128x32xf32>
    %51 = tpu.matmul %49, %50, %cst_22 {dimension_numbers = #tpu.dot_dimension_numbers<[0], [0], [1], [1], [0, 1, 1, 1], [], []>, precision = #tpu.contract_precision<fp32>} : vector<32x128xf32>, vector<32x32xf32>, vector<128x32xf32> -> vector<128x32xf32>
    %c0_23 = arith.constant 0 : index
    %c64 = arith.constant 64 : index
    %52 = vector.load %arg3[%c0_23, %c64] : memref<128x128xf32, #tpu.memory_space<vmem>>, vector<128x32xf32>
    %53 = arith.addf %51, %52 : vector<128x32xf32>
    %c0_24 = arith.constant 0 : index
    %c64_25 = arith.constant 64 : index
    %54 = vector.load %arg4[%c0_24, %c64_25] : memref<128x128xf32, #tpu.memory_space<vmem>>, vector<128x32xf32>
    tpu.vector_store %arg4[%c0_24, %c64_25], %53 {strides = array<i32>} : memref<128x128xf32, #tpu.memory_space<vmem>>, vector<128x32xf32>,
    %c3 = arith.constant 3 : index
    %c0_26 = arith.constant 0 : index
    %55 = vector.load %arg1[%c3, %c0_26] : memref<8x128xi32, #tpu.memory_space<vmem>>, vector<1x128xi32>
    %c7 = arith.constant 7 : index
    %c0_27 = arith.constant 0 : index
    %56 = vector.load %arg1[%c7, %c0_27] : memref<8x128xi32, #tpu.memory_space<vmem>>, vector<1x128xi32>
    %c12_i32_28 = arith.constant 12 : i32
    %57 = vector.broadcast %c12_i32_28 : i32 to vector<1x128xi32>
    %58 = arith.minsi %55, %57 : vector<1x128xi32>
    %59 = vector.broadcast %0 : vector<32x1xi32> to vector<32x128xi32>
    %60 = vector.broadcast %58 : vector<1x128xi32> to vector<32x128xi32>
    %61 = arith.cmpi eq, %59, %60 : vector<32x128xi32>
    %62 = vector.broadcast %0 : vector<32x1xi32> to vector<32x128xi32>
    %63 = vector.broadcast %56 : vector<1x128xi32> to vector<32x128xi32>
    %64 = arith.cmpi eq, %62, %63 : vector<32x128xi32>
    %65 = arith.ori %61, %64 : vector<32x128xi1>
    %66 = arith.extui %65 : vector<32x128xi1> to vector<32x128xi32>
    %67 = arith.sitofp %66 : vector<32x128xi32> to vector<32x128xf32>
    %c0_29 = arith.constant 0 : index
    %c0_30 = arith.constant 0 : index
    %68 = vector.load %arg2[%c0_29, %c0_30] : memref<32x32xf32, #tpu.memory_space<vmem>>, vector<32x32xf32>
    %cst_31 = arith.constant dense<0.000000e+00> : vector<128x32xf32>
    %69 = tpu.matmul %67, %68, %cst_31 {dimension_numbers = #tpu.dot_dimension_numbers<[0], [0], [1], [1], [0, 1, 1, 1], [], []>, precision = #tpu.contract_precision<fp32>} : vector<32x128xf32>, vector<32x32xf32>, vector<128x32xf32> -> vector<128x32xf32>
    %c0_32 = arith.constant 0 : index
    %c96 = arith.constant 96 : index
    %70 = vector.load %arg3[%c0_32, %c96] : memref<128x128xf32, #tpu.memory_space<vmem>>, vector<128x32xf32>
    %71 = arith.addf %69, %70 : vector<128x32xf32>
    %c0_33 = arith.constant 0 : index
    %c96_34 = arith.constant 96 : index
    %72 = vector.load %arg4[%c0_33, %c96_34] : memref<128x128xf32, #tpu.memory_space<vmem>>, vector<128x32xf32>
    tpu.vector_store %arg4[%c0_33, %c96_34], %71 {strides = array<i32>} : memref<128x128xf32, #tpu.memory_space<vmem>>, vector<128x32xf32>,
    return
  }
  func.func @transform_0(%arg0: i32) -> (i32, i32) {
    %c0_i32 = arith.constant 0 : i32
    %c0_i32_0 = arith.constant 0 : i32
    return %c0_i32, %arg0 : i32, i32
  }
  func.func @transform_1(%arg0: i32) -> (i32, i32) {
    %c0_i32 = arith.constant 0 : i32
    %c0_i32_0 = arith.constant 0 : i32
    %c0_i32_1 = arith.constant 0 : i32
    return %c0_i32, %c0_i32_0 : i32, i32
  }
  func.func @transform_2(%arg0: i32) -> (i32, i32) {
    %c0_i32 = arith.constant 0 : i32
    %c0_i32_0 = arith.constant 0 : i32
    %c0_i32_1 = arith.constant 0 : i32
    return %c0_i32, %c0_i32_0 : i32, i32
  }
  func.func @transform_3(%arg0: i32) -> (i32, i32) {
    %c0_i32 = arith.constant 0 : i32
    %c0_i32_0 = arith.constant 0 : i32
    return %arg0, %c0_i32 : i32, i32
  }
}

</mosaic_0001>

<bundles_post_ra>
// kernel: forward.1
= control target key start
LH: loop header
LB: loop body
LE: loop exit
PB: predicated region body
PF: predicated region fallthrough
CT: control target
= control target key end

     0   :  { %8 = vsyncpa [#allocation3], 0  ;;  %s7605_s12 = smov [#allocation2]   ;;  %s9664_s0 = inlined_call_operand.vmem [shape: s32[8,128], index: 0, kind: input, shape index: {}]   ;;  %s9665_s1 = inlined_call_operand.vmem [shape: f32[32,32], index: 1, kind: input, shape index: {}]   ;;  %s9666_s2 = inlined_call_operand.hbm [shape: f32[128,128], index: 2, kind: input, shape index: {}]   ;;  %s9667_s3 = inlined_call_operand.vmem [shape: f32[128,128], index: 3, kind: output, shape index: {}]  }
   0x1   :  { %s18_s13 = sshll.u32 %s7605_s12, 4  ;;  %s7581_s16 = scalar_lea.hbm %s9666_s2, 2048  ;;  %s19_s13 = int_to_ptr.vmem [resolvable:$true] %s18_s13 }
   0x2   :  { %p7582_p0 = scmp.ne.s32.totalorder %s9666_s2, %s7581_s16  ;;  %p7585_p1 = scmp.lt.u32.totalorder %s7581_s16, %s9666_s2 }
   0x4   :  { %p7587_p2 = pnand %p7585_p1, %p7582_p0 }
   0x6   :  { %7590 = shalt.err (!%p7587_p2)
}
   0x7   :  { %s7591_s21 = scalar_lea.vmem %s19_s13, 2048  ;;  %p7596_p4 = scmp.lt.s32.totalorder %s19_s13, %s19_s13 }
   0x8   :  { %p7592_p3 = scmp.ne.s32.totalorder %s19_s13, %s7591_s21  ;;  %p7597_p5 = scmp.lt.s32.totalorder %s7591_s21, %s7591_s21 }
   0xa   :  { %p7598_p6 = por %p7597_p5, %p7596_p4 }
   0xc   :  { %p7599_p7 = pnand %p7598_p6, %p7592_p3 }
   0xe   :  { %7602 = shalt.err (!%p7599_p7)
}
   0xf   :  { %s7606_s22 = smov 128   ;;  %s7607_s23 = smov 8  }
  0x10   :  { %24 = dma.hbm_to_vmem [thread:$0]  %s9666_s2, 2048, %s19_s13, [#allocation3], %s7606_s22, %s7606_s22, %s7607_s23  }
  0x11   :  { %7603 = dma.done.wait [#allocation3], 2048  }
  0x12   :  { %7604 = vsyncadd [#allocation3], 4294965248  ;;  %v28_v0 = vlaneseq  ;;  %v33_v3 = vld [vmem:[%s9664_s0] sm:$0x1]  ;;  %v5538_v4 = vld [vmem:[%s9664_s0 + $0x4] ss:$0 sm:$0xff] }
  0x13   :  { %v1312_v5 = vld [vmem:[%s9664_s0 + $0x1] sm:$0x1]  ;;  %vm35_vm0 = vcmp.lt.s32.totalorder %v33_v3, 12  ;;  %v5543_v6 = vld [vmem:[%s9664_s0 + $0x5] ss:$0 sm:$0xff]  ;;  %v7608_v14 = vmov 0.0  }
  0x14   :  { %v7644_v1 = vshrl.u32 %v28_v0, 7  ;;  %vm1314_vm1 = vcmp.lt.s32.totalorder %v1312_v5, 12  ;;  %v36_v8 = vsel %vm35_vm0, %v33_v3, 12  ;;  %v65_v26 = vld [vmem:[%s9665_s1] sm:$0xff]  ;;  %v66_v27 = vld [vmem:[%s9665_s1 + $0x8] sm:$0xff]  ;;  %v67_v32 = vld [vmem:[%s9665_s1 + $0x10] sm:$0xff] }
  0x15   :  { %v1315_v9 = vsel %vm1314_vm1, %v1312_v5, 12  ;;  %v167_v28 = vand.u32 4294901760, %v65_v26  ;;  %v170_v29 = vand.u32 4294901760, %v66_v27  ;;  %v68_v33 = vld [vmem:[%s9665_s1 + $0x18] sm:$0xff]  ;;  %v173_v34 = vand.u32 4294901760, %v67_v32  ;;  %s7609_s25 = smov 96  }
  0x16   :  { %v7647_v2 = vsub.s32 0, %v7644_v1  ;;  %v7662_v7 = vadd.s32 8, %v7644_v1  ;;  %vm49_vm2 = vcmp.eq.s32.totalorder %v7644_v1, %v5538_v4  ;;  %v7668_v12 = vadd.s32 16, %v7644_v1  ;;  %v2719_v46 = vld [vmem:[%s9664_s0 + $0x2] sm:$0x1]  ;;  %s7611_s30 = smov 32  }
  0x17   :  { %vm1328_vm3 = vcmp.eq.s32.totalorder %v7644_v1, %v5543_v6  ;;  %v7672_v13 = vadd.s32 24, %v7644_v1  ;;  %v7702_v31 = vpack.c.bf16 %v170_v29, %v167_v28  ;;  %v176_v35 = vand.u32 4294901760, %v68_v33  ;;  %v4126_v47 = vld [vmem:[%s9664_s0 + $0x3] sm:$0x1]  ;;  %v5548_v52 = vld [vmem:[%s9664_s0 + $0x6] ss:$0 sm:$0xff] }
  0x18   :  { %v40_v10 = vrot.slane %v36_v8, %v7647_v2  ;;  %v1319_v11 = vrot.slane %v1315_v9, %v7647_v2  ;;  %vm50_vm7 = vcmp.eq.s32.totalorder %v7662_v7, %v5538_v4  ;;  %vm1329_vm10 = vcmp.eq.s32.totalorder %v7662_v7, %v5543_v6  ;;  %v5553_v53 = vld [vmem:[%s9664_s0 + $0x7] ss:$0 sm:$0xff] }
  0x19   :  { %vm51_vm13 = vcmp.eq.s32.totalorder %v7668_v12, %v5538_v4  ;;  %vm1330_vm0 = vcmp.eq.s32.totalorder %v7668_v12, %v5543_v6  ;;  %6807 = vmatprep.subr.bf16.mxu0 %v7702_v31  ;;  %6855 = vmatprep.subr.bf16.mxu1 %v7702_v31  ;;  %v7714_v36 = vpack.c.bf16 %v176_v35, %v173_v34 }
  0x1a   :  { %vm41_vm4 = vcmp.eq.s32.totalorder %v7644_v1, %v40_v10  ;;  %vm1320_vm5 = vcmp.eq.s32.totalorder %v7644_v1, %v1319_v11  ;;  %vm42_vm6 = vcmp.eq.s32.totalorder %v7662_v7, %v40_v10  ;;  %vm1321_vm9 = vcmp.eq.s32.totalorder %v7662_v7, %v1319_v11  ;;  %6809 = vmatpush3.bf16.msra.mxu0 %v7702_v31 }
  0x1b   :  { %vm53_vm8 = vmor %vm41_vm4, %vm49_vm2  ;;  %vm43_vm12 = vcmp.eq.s32.totalorder %v7668_v12, %v40_v10  ;;  %vm1322_vm15 = vcmp.eq.s32.totalorder %v7668_v12, %v1319_v11  ;;  %vm44_vm2 = vcmp.eq.s32.totalorder %v7672_v13, %v40_v10  ;;  %vm52_vm4 = vcmp.eq.s32.totalorder %v7672_v13, %v5538_v4  ;;  %6857 = vmatpush3.bf16.msra.mxu1 %v7702_v31 }
  0x1c   :  { %v5539_v15 = vsel %vm53_vm8, 1.0, %v7608_v14  ;;  %vm1332_vm11 = vmor %vm1320_vm5, %vm1328_vm3  ;;  %vm1323_vm5 = vcmp.eq.s32.totalorder %v7672_v13, %v1319_v11  ;;  %vm1331_vm8 = vcmp.eq.s32.totalorder %v7672_v13, %v5543_v6  ;;  %6811 = vmatprep.subr.bf16.mxu0 %v7714_v36  ;;  %6859 = vmatprep.subr.bf16.mxu1 %v7714_v36  ;;  %v7720_v37 = vsub.f32 %v65_v26, %v167_v28 }
  0x1d   :  { %v5544_v16 = vsel %vm1332_vm11, 1.0, %v7608_v14  ;;  %vm54_vm14 = vmor %vm42_vm6, %vm50_vm7  ;;  %v7722_v38 = vsub.f32 %v66_v27, %v170_v29  ;;  %vm4128_vm11 = vcmp.lt.s32.totalorder %v4126_v47, 12  ;;  %v7761_v58 = vsub.f32 %v67_v32, %v173_v34 }
  0x1e   :  { %v7389_v17 = vpack.i.bf16 %v5544_v16, %v5539_v15  ;;  %v5540_v18 = vsel %vm54_vm14, 1.0, %v7608_v14  ;;  %vm1333_vm1 = vmor %vm1321_vm9, %vm1329_vm10  ;;  %6813 = vmatpush3.bf16.msra.mxu0 %v7714_v36  ;;  %v9687_v39 = vand.u32 4294901760, %v7720_v37  ;;  %vm2721_vm10 = vcmp.lt.s32.totalorder %v2719_v46, 12 }
  0x1f   :  { %v5545_v19 = vsel %vm1333_vm1, 1.0, %v7608_v14  ;;  %vm55_vm3 = vmor %vm43_vm12, %vm51_vm13  ;;  %6861 = vmatpush3.bf16.msra.mxu1 %v7714_v36  ;;  %v9686_v40 = vand.u32 4294901760, %v7722_v38  ;;  %v2722_v48 = vsel %vm2721_vm10, %v2719_v46, 12  ;;  %v4129_v49 = vsel %vm4128_vm11, %v4126_v47, 12  ;;  %9906 = vst [vmem:[#allocation5_spill] sm:$0xff] %v7761_v58 }
  0x20   :  { %7390 = vxpose.xlu0.b32.start [1/4] (short) %v7389_v17, 128  ;;  %v7391_v20 = vpack.i.bf16 %v5545_v19, %v5540_v18  ;;  %vm1334_vm6 = vmor %vm1322_vm15, %vm1330_vm0  ;;  %v5541_v21 = vsel %vm55_vm3, 1.0, %v7608_v14  ;;  %v399_v41 = vsub.f32 %v7720_v37, %v9687_v39  ;;  %v2726_v50 = vrot.slane %v2722_v48, %v7647_v2 }
  0x21   :  { %v5546_v22 = vsel %vm1334_vm6, 1.0, %v7608_v14  ;;  %vm56_vm7 = vmor %vm44_vm2, %vm52_vm4  ;;  %v406_v42 = vsub.f32 %v7722_v38, %v9686_v40  ;;  %v4133_v51 = vrot.slane %v4129_v49, %v7647_v2  ;;  %vm2735_vm13 = vcmp.eq.s32.totalorder %v7644_v1, %v5548_v52 }
  0x22   :  { %vm1335_vm9 = vmor %vm1323_vm5, %vm1331_vm8  ;;  %v7393_v23 = vpack.i.bf16 %v5546_v22, %v5541_v21  ;;  %v5542_v24 = vsel %vm56_vm7, 1.0, %v7608_v14  ;;  %v400_v43 = vand.u32 4294901760, %v399_v41  ;;  %vm2727_vm12 = vcmp.eq.s32.totalorder %v7644_v1, %v2726_v50 }
  0x23   :  { %v5547_v25 = vsel %vm1335_vm9, 1.0, %v7608_v14  ;;  %v407_v44 = vand.u32 4294901760, %v406_v42  ;;  %vm4134_vm14 = vcmp.eq.s32.totalorder %v7644_v1, %v4133_v51  ;;  %vm4142_vm15 = vcmp.eq.s32.totalorder %v7644_v1, %v5553_v53  ;;  %vm2739_vm0 = vmor %vm2727_vm12, %vm2735_vm13 }
  0x24   :  { %7392 = vxpose.xlu0.b32.cont [2/4] (short) %v7391_v20, 128  ;;  %v7395_v30 = vpack.i.bf16 %v5547_v25, %v5542_v24  ;;  %v5549_v54 = vsel %vm2739_vm0, 1.0, %v7608_v14  ;;  %vm4146_vm1 = vmor %vm4134_vm14, %vm4142_vm15  ;;  %vm2728_vm2 = vcmp.eq.s32.totalorder %v7662_v7, %v2726_v50  ;;  %vm2736_vm4 = vcmp.eq.s32.totalorder %v7662_v7, %v5548_v52 }
  0x25   :  { %v7732_v45 = vpack.c.bf16 %v407_v44, %v400_v43  ;;  %v5554_v55 = vsel %vm4146_vm1, 1.0, %v7608_v14  ;;  %vm4135_vm3 = vcmp.eq.s32.totalorder %v7662_v7, %v4133_v51  ;;  %vm2740_vm5 = vmor %vm2728_vm2, %vm2736_vm4  ;;  %vm4143_vm8 = vcmp.eq.s32.totalorder %v7662_v7, %v5553_v53 }
  0x26   :  { %v7477_v56 = vpack.i.bf16 %v5554_v55, %v5549_v54  ;;  %v5550_v57 = vsel %vm2740_vm5, 1.0, %v7608_v14  ;;  %vm4147_vm6 = vmor %vm4135_vm3, %vm4143_vm8  ;;  %v7763_v59 = vsub.f32 %v68_v33, %v176_v35  ;;  %v9681_v62 = vand.u32 4294901760, %v7761_v58 }
  0x27   :  { %6815 = vmatprep.subr.bf16.mxu0 %v7732_v45  ;;  %6863 = vmatprep.subr.bf16.mxu1 %v7732_v45  ;;  %v5555_v60 = vsel %vm4147_vm6, 1.0, %v7608_v14  ;;  %vm2729_vm7 = vcmp.eq.s32.totalorder %v7668_v12, %v2726_v50  ;;  %vm2737_vm9 = vcmp.eq.s32.totalorder %v7668_v12, %v5548_v52  ;;  %vm4136_vm11 = vcmp.eq.s32.totalorder %v7668_v12, %v4133_v51 }
  0x28   :  { %7394 = vxpose.xlu0.b32.cont [3/4] (short) %v7393_v23, 128  ;;  %7478 = vxpose.xlu1.b32.start [1/4] (short) %v7477_v56, 128  ;;  %9907 = vst [vmem:[#allocation6_spill] sm:$0xff] %v7763_v59  ;;  %v7479_v61 = vpack.i.bf16 %v5555_v60, %v5550_v57  ;;  %v9680_v63 = vand.u32 4294901760, %v7763_v59  ;;  %vm2741_vm10 = vmor %vm2729_vm7, %vm2737_vm9  ;;  %vm4144_vm12 = vcmp.eq.s32.totalorder %v7668_v12, %v5553_v53  ;;  %vm117_vm3 = vcmask 261120  }
  0x29   :  { %v413_v0 = vsub.f32 %v7761_v58, %v9681_v62  ;;  %v5551_v2 = vsel %vm2741_vm10, 1.0, %v7608_v14  ;;  %vm4148_vm13 = vmor %vm4136_vm11, %vm4144_vm12  ;;  %vm2730_vm14 = vcmp.eq.s32.totalorder %v7672_v13, %v2726_v50  ;;  %vm2738_vm15 = vcmp.eq.s32.totalorder %v7672_v13, %v5548_v52 }
  0x2a   :  { %v420_v1 = vsub.f32 %v7763_v59, %v9680_v63  ;;  %v5556_v3 = vsel %vm4148_vm13, 1.0, %v7608_v14  ;;  %vm4137_vm0 = vcmp.eq.s32.totalorder %v7672_v13, %v4133_v51  ;;  %vm4145_vm1 = vcmp.eq.s32.totalorder %v7672_v13, %v5553_v53  ;;  %vm2742_vm2 = vmor %vm2730_vm14, %vm2738_vm15 }
  0x2b   :  { %v414_v4 = vand.u32 4294901760, %v413_v0  ;;  %v7481_v6 = vpack.i.bf16 %v5556_v3, %v5551_v2  ;;  %v5552_v8 = vsel %vm2742_vm2, 1.0, %v7608_v14  ;;  %vm4149_vm4 = vmor %vm4137_vm0, %vm4145_vm1  ;;  %v7790_v10 = vpack.c.bf16 %v7722_v38, %v7720_v37 }
  0x2c   :  { %7396 = vxpose.xlu0.b32.end [4/4] (short) %v7395_v30, 128  ;;  %7480 = vxpose.xlu1.b32.cont [2/4] (short) %v7479_v61, 128  ;;  %v421_v5 = vand.u32 4294901760, %v420_v1  ;;  %v5557_v9 = vsel %vm4149_vm4, 1.0, %v7608_v14  ;;  %v7794_v12 = vpack.c.bf16 %v7763_v59, %v7761_v58  ;;  %vm2702_vm5 = vcmask 523520  }
  0x2d   :  { %v7483_v11 = vpack.i.bf16 %v5557_v9, %v5552_v8  ;;  %vm4109_vm8 = vcmask 785920   ;;  %vm5516_vm6 = vcmask 1048320  }
  0x2e   :  { %v7784_v7 = vpack.c.bf16 %v421_v5, %v414_v4 }
  0x30   :  { %7482 = vxpose.xlu1.b32.cont [3/4] (short) %v7481_v6, 128 }
  0x34   :  { %7484 = vxpose.xlu1.b32.end [4/4] (short) %v7483_v11, 128 }
  0xa0   :  { %v7397_v13 = vpop.trf.xlu0 }
  0xa1   :  { %v7398_v15 = vunpack.i.l.bf16 %v7397_v13  ;;  %v7401_v16 = vunpack.i.h.bf16 %v7397_v13 }
  0xa3   :  { %v119_v17 = vsel %vm117_vm3, %v7398_v15, 0  ;;  %v1461_v18 = vsel %vm117_vm3, %v7401_v16, 0 }
  0xa4   :  { %v7402_v19 = vpop.trf.xlu0  ;;  %v7798_v14 = vand.u32 4294901760, %v119_v17  ;;  %v7800_v20 = vand.u32 4294901760, %v1461_v18 }
  0xa5   :  { %v7406_v21 = vunpack.i.h.bf16 %v7402_v19  ;;  %v7403_v22 = vunpack.i.l.bf16 %v7402_v19 }
  0xa6   :  { %v7803_v23 = vsub.f32 %v119_v17, %v7798_v14  ;;  %v7806_v24 = vsub.f32 %v1461_v18, %v7800_v20 }
  0xa7   :  { %v122_v25 = vsel %vm117_vm3, %v7403_v22, 0  ;;  %v1464_v26 = vsel %vm117_vm3, %v7406_v21, 0 }
  0xa8   :  { %v7407_v27 = vpop.trf.xlu0  ;;  %v9684_v28 = vand.u32 4294901760, %v7803_v23  ;;  %v9682_v29 = vand.u32 4294901760, %v7806_v24  ;;  %v7812_v30 = vand.u32 4294901760, %v122_v25  ;;  %v7814_v32 = vand.u32 4294901760, %v1464_v26 }
  0xa9   :  { %v7411_v33 = vunpack.i.h.bf16 %v7407_v27  ;;  %v7408_v34 = vunpack.i.l.bf16 %v7407_v27 }
  0xaa   :  { %v238_v35 = vsub.f32 %v7803_v23, %v9684_v28  ;;  %v1580_v41 = vsub.f32 %v7806_v24, %v9682_v29  ;;  %v7823_v42 = vsub.f32 %v122_v25, %v7812_v30  ;;  %v7826_v43 = vsub.f32 %v1464_v26, %v7814_v32 }
  0xab   :  { %v125_v44 = vsel %vm117_vm3, %v7408_v34, 0  ;;  %v1467_v46 = vsel %vm117_vm3, %v7411_v33, 0 }
  0xac   :  { %v7412_v47 = vpop.trf.xlu0  ;;  %v239_v48 = vand.u32 4294901760, %v238_v35  ;;  %v1581_v49 = vand.u32 4294901760, %v1580_v41  ;;  %v9679_v50 = vand.u32 4294901760, %v7823_v42  ;;  %v9678_v51 = vand.u32 4294901760, %v7826_v43 }
  0xad   :  { %v7416_v52 = vunpack.i.h.bf16 %v7412_v47  ;;  %v7413_v53 = vunpack.i.l.bf16 %v7412_v47  ;;  %v7838_v56 = vand.u32 4294901760, %v125_v44  ;;  %v7840_v57 = vand.u32 4294901760, %v1467_v46 }
  0xae   :  { %6046 = vmatprep.mubr.f32.mxu0 %v239_v48  ;;  %6238 = vmatprep.mubr.f32.mxu1 %v1581_v49  ;;  %v248_v54 = vsub.f32 %v7823_v42, %v9679_v50  ;;  %v1590_v55 = vsub.f32 %v7826_v43, %v9678_v51 }
  0xaf   :  { %v128_v60 = vsel %vm117_vm3, %v7413_v53, 0  ;;  %v1470_v61 = vsel %vm117_vm3, %v7416_v52, 0  ;;  %v7845_v3 = vsub.f32 %v125_v44, %v7838_v56  ;;  %v7848_v4 = vsub.f32 %v1467_v46, %v7840_v57 }
  0xb0   :  { %v7417_v0 = vpop.trf.xlu0  ;;  %v249_v1 = vand.u32 4294901760, %v248_v54  ;;  %v1591_v2 = vand.u32 4294901760, %v1590_v55  ;;  %v7852_v11 = vand.u32 4294901760, %v128_v60  ;;  %v7854_v13 = vand.u32 4294901760, %v1470_v61 }
  0xb1   :  { %v7421_v5 = vunpack.i.h.bf16 %v7417_v0  ;;  %v7418_v6 = vunpack.i.l.bf16 %v7417_v0  ;;  %v9675_v8 = vand.u32 4294901760, %v7845_v3  ;;  %v9674_v9 = vand.u32 4294901760, %v7848_v4 }
  0xb2   :  { %6047 = vmatmul.mubr.f32.vlgmr.msra.gmra.mrb[0].mxu0 %v249_v1  ;;  %6239 = vmatmul.mubr.f32.vlgmr.msra.gmra.mrb[0].mxu1 %v1591_v2  ;;  %v7867_v21 = vsub.f32 %v128_v60, %v7852_v11  ;;  %v7870_v22 = vsub.f32 %v1470_v61, %v7854_v13 }
  0xb3   :  { %v131_v15 = vsel %vm117_vm3, %v7418_v6, 0  ;;  %v1473_v16 = vsel %vm117_vm3, %v7421_v5, 0  ;;  %6817 = vmatpush3.bf16.msra.mxu0 %v7732_v45  ;;  %6865 = vmatpush3.bf16.msra.mxu1 %v7732_v45  ;;  %v258_v18 = vsub.f32 %v7845_v3, %v9675_v8  ;;  %v1600_v19 = vsub.f32 %v7848_v4, %v9674_v9 }
  0xb4   :  { %v7422_v17 = vpop.trf.xlu0  ;;  %9908 = vst [vmem:[#allocation7_spill] sm:$0xff] %v7870_v22  ;;  %6819 = vmatprep.subr.bf16.mxu0 %v7784_v7  ;;  %6867 = vmatprep.subr.bf16.mxu1 %v7784_v7  ;;  %v9672_v33 = vand.u32 4294901760, %v7867_v21  ;;  %v9670_v34 = vand.u32 4294901760, %v7870_v22  ;;  %v7876_v35 = vand.u32 4294901760, %v131_v15  ;;  %v7878_v41 = vand.u32 4294901760, %v1473_v16 }
  0xb5   :  { %v7426_v25 = vunpack.i.h.bf16 %v7422_v17  ;;  %v7423_v26 = vunpack.i.l.bf16 %v7422_v17  ;;  %v259_v45 = vand.u32 4294901760, %v258_v18  ;;  %v1601_v27 = vand.u32 4294901760, %v1600_v19 }
  0xb6   :  { %v268_v48 = vsub.f32 %v7867_v21, %v9672_v33  ;;  %v1610_v49 = vsub.f32 %v7870_v22, %v9670_v34  ;;  %v7897_v61 = vsub.f32 %v131_v15, %v7876_v35  ;;  %v7900_v0 = vsub.f32 %v1473_v16, %v7878_v41 }
  0xb7   :  { %v134_v44 = vsel %vm117_vm3, %v7423_v26, 0  ;;  %v1476_v46 = vsel %vm117_vm3, %v7426_v25, 0  ;;  %6821 = vmatpush3.bf16.msra.mxu0 %v7784_v7  ;;  %6869 = vmatpush3.bf16.msra.mxu1 %v7784_v7 }
  0xb8   :  { %6049 = vmatprep.mubr.f32.mxu0 %v259_v45  ;;  %6241 = vmatprep.mubr.f32.mxu1 %v1601_v27  ;;  %v7427_v47 = vpop.trf.xlu0  ;;  %v7890_v52 = vand.u32 4294901760, %v134_v44  ;;  %v7892_v53 = vand.u32 4294901760, %v1476_v46  ;;  %v269_v7 = vand.u32 4294901760, %v268_v48  ;;  %v1611_v60 = vand.u32 4294901760, %v1610_v49  ;;  %9909 = vst [vmem:[#allocation8_spill] sm:$0xff] %v7897_v61  ;;  %9910 = vst [vmem:[#allocation9_spill] sm:$0xff] %v7900_v0 }
  0xb9   :  { %v7431_v54 = vunpack.i.h.bf16 %v7427_v47  ;;  %v7428_v55 = vunpack.i.l.bf16 %v7427_v47  ;;  %6823 = vmatprep.subr.bf16.mxu0 %v7790_v10  ;;  %6871 = vmatprep.subr.bf16.mxu1 %v7790_v10  ;;  %v9669_v18 = vand.u32 4294901760, %v7897_v61  ;;  %v9668_v15 = vand.u32 4294901760, %v7900_v0 }
  0xba   :  { %v7903_v1 = vsub.f32 %v134_v44, %v7890_v52  ;;  %v7906_v2 = vsub.f32 %v1476_v46, %v7892_v53  ;;  %6050 = vmatmul.mubr.f32.gmra.mrb[2].mxu0 %v269_v7  ;;  %6242 = vmatmul.mubr.f32.gmra.mrb[2].mxu1 %v1611_v60 }
  0xbb   :  { %v137_v5 = vsel %vm117_vm3, %v7428_v55, 0  ;;  %v1479_v6 = vsel %vm117_vm3, %v7431_v54, 0  ;;  %v278_v45 = vsub.f32 %v7897_v61, %v9669_v18  ;;  %v1620_v27 = vsub.f32 %v7900_v0, %v9668_v15 }
  0xbc   :  { %9911 = vst [vmem:[#allocation10_spill] sm:$0xff] %v7903_v1  ;;  %9912 = vst [vmem:[#allocation11_spill] sm:$0xff] %v7906_v2  ;;  %v7432_v17 = vpop.trf.xlu0  ;;  %v7912_v19 = vand.u32 4294901760, %v137_v5  ;;  %v7914_v16 = vand.u32 4294901760, %v1479_v6  ;;  %v9671_v44 = vand.u32 4294901760, %v7903_v1  ;;  %v9673_v46 = vand.u32 4294901760, %v7906_v2 }
  0xbd   :  { %v7436_v25 = vunpack.i.h.bf16 %v7432_v17  ;;  %v7433_v26 = vunpack.i.l.bf16 %v7432_v17  ;;  %v279_v55 = vand.u32 4294901760, %v278_v45  ;;  %v1621_v7 = vand.u32 4294901760, %v1620_v27 }
  0xbe   :  { %v7925_v47 = vsub.f32 %v137_v5, %v7912_v19  ;;  %v7928_v48 = vsub.f32 %v1479_v6, %v7914_v16  ;;  %v288_v17 = vsub.f32 %v7903_v1, %v9671_v44  ;;  %v1630_v15 = vsub.f32 %v7906_v2, %v9673_v46 }
  0xbf   :  { %v140_v49 = vsel %vm117_vm3, %v7433_v26, 0  ;;  %v1482_v54 = vsel %vm117_vm3, %v7436_v25, 0  ;;  %6052 = vmatprep.mubr.f32.mxu0 %v279_v55  ;;  %6244 = vmatprep.mubr.f32.mxu1 %v1621_v7 }
  0xc0   :  { %9913 = vst [vmem:[#allocation12_spill] sm:$0xff] %v7925_v47  ;;  %9914 = vst [vmem:[#allocation13_spill] sm:$0xff] %v7928_v48  ;;  %v7437_v60 = vpop.trf.xlu0  ;;  %v289_v6 = vand.u32 4294901760, %v288_v17  ;;  %v1631_v34 = vand.u32 4294901760, %v1630_v15  ;;  %v9676_v26 = vand.u32 4294901760, %v7925_v47  ;;  %v9677_v25 = vand.u32 4294901760, %v7928_v48 }
  0xc1   :  { %v7441_v5 = vunpack.i.h.bf16 %v7437_v60  ;;  %v7438_v18 = vunpack.i.l.bf16 %v7437_v60  ;;  %v7940_v45 = vand.u32 4294901760, %v140_v49  ;;  %v7942_v27 = vand.u32 4294901760, %v1482_v54 }
  0xc2   :  { %6053 = vmatmul.mubr.f32.gmra.mrb[4].mxu0 %v289_v6  ;;  %6245 = vmatmul.mubr.f32.gmra.mrb[4].mxu1 %v1631_v34  ;;  %v298_v55 = vsub.f32 %v7925_v47, %v9676_v26  ;;  %v1640_v15 = vsub.f32 %v7928_v48, %v9677_v25 }
  0xc3   :  { %v143_v44 = vsel %vm117_vm3, %v7438_v18, 0  ;;  %v1485_v33 = vsel %vm117_vm3, %v7441_v5, 0  ;;  %v7957_v5 = vsub.f32 %v140_v49, %v7940_v45  ;;  %v7960_v34 = vsub.f32 %v1482_v54, %v7942_v27 }
  0xc4   :  { %v7442_v46 = vpop.trf.xlu0  ;;  %v7952_v7 = vand.u32 4294901760, %v143_v44  ;;  %v7954_v60 = vand.u32 4294901760, %v1485_v33  ;;  %v299_v18 = vand.u32 4294901760, %v298_v55  ;;  %v1641_v8 = vand.u32 4294901760, %v1640_v15 }
  0xc5   :  { %v7446_v17 = vunpack.i.h.bf16 %v7442_v46  ;;  %v7443_v9 = vunpack.i.l.bf16 %v7442_v46  ;;  %9915 = vst [vmem:[#allocation14_spill] sm:$0xff] %v7957_v5  ;;  %9916 = vst [vmem:[#allocation15_spill] sm:$0xff] %v7960_v34  ;;  %v9683_v55 = vand.u32 4294901760, %v7957_v5  ;;  %v9685_v49 = vand.u32 4294901760, %v7960_v34 }
  0xc6   :  { %v7963_v6 = vsub.f32 %v143_v44, %v7952_v7  ;;  %v7966_v26 = vsub.f32 %v1485_v33, %v7954_v60  ;;  %6055 = vmatprep.mubr.f32.mxu0 %v299_v18  ;;  %6247 = vmatprep.mubr.f32.mxu1 %v1641_v8 }
  0xc7   :  { %v146_v25 = vsel %vm117_vm3, %v7443_v9, 0  ;;  %v1488_v51 = vsel %vm117_vm3, %v7446_v17, 0  ;;  %v308_v33 = vsub.f32 %v7957_v5, %v9683_v55  ;;  %v1650_v9 = vsub.f32 %v7960_v34, %v9685_v49 }
  0xc8   :  { %9917 = vst [vmem:[#allocation16_spill] sm:$0xff] %v7963_v6  ;;  %9918 = vst [vmem:[#allocation17_spill] sm:$0xff] %v7966_v26  ;;  %v7447_v46 = vpop.trf.xlu0  ;;  %v7972_v15 = vand.u32 4294901760, %v146_v25  ;;  %v7974_v54 = vand.u32 4294901760, %v1488_v51  ;;  %v9689_v8 = vand.u32 4294901760, %v7963_v6  ;;  %v9691_v17 = vand.u32 4294901760, %v7966_v26 }
  0xc9   :  { %v7451_v44 = vunpack.i.h.bf16 %v7447_v46  ;;  %v7448_v50 = vunpack.i.l.bf16 %v7447_v46  ;;  %v309_v29 = vand.u32 4294901760, %v308_v33  ;;  %v1651_v55 = vand.u32 4294901760, %v1650_v9 }
  0xca   :  { %9919 = vst [vmem:[#allocation18_spill] sm:$0xff] %v7972_v15  ;;  %9920 = vst [vmem:[#allocation19_spill] sm:$0xff] %v7974_v54  ;;  %v7985_v18 = vsub.f32 %v146_v25, %v7972_v15  ;;  %v7988_v63 = vsub.f32 %v1488_v51, %v7974_v54  ;;  %v318_v49 = vsub.f32 %v7963_v6, %v9689_v8 }
  0xcb   :  { %v149_v46 = vsel %vm117_vm3, %v7448_v50, 0  ;;  %v1491_v62 = vsel %vm117_vm3, %v7451_v44, 0  ;;  %v1660_v40 = vsub.f32 %v7966_v26, %v9691_v17  ;;  %6056 = vmatmul.mubr.f32.gmra.mrb[6].mxu0 %v309_v29  ;;  %6248 = vmatmul.mubr.f32.gmra.mrb[6].mxu1 %v1651_v55 }
  0xcc   :  { %9921 = vst [vmem:[#allocation20_spill] sm:$0xff] %v7985_v18  ;;  %9922 = vst [vmem:[#allocation21_spill] sm:$0xff] %v7988_v63  ;;  %v7452_v28 = vpop.trf.xlu0  ;;  %v319_v51 = vand.u32 4294901760, %v318_v49  ;;  %v9696_v50 = vand.u32 4294901760, %v7985_v18  ;;  %v9697_v44 = vand.u32 4294901760, %v7988_v63  ;;  %v8000_v33 = vand.u32 4294901760, %v149_v46 }
  0xcd   :  { %v7456_v25 = vunpack.i.h.bf16 %v7452_v28  ;;  %v7453_v39 = vunpack.i.l.bf16 %v7452_v28  ;;  %v1661_v59 = vand.u32 4294901760, %v1660_v40  ;;  %v8002_v9 = vand.u32 4294901760, %v1491_v62 }
  0xce   :  { %9923 = vst [vmem:[#allocation22_spill] sm:$0xff] %v8000_v33  ;;  %6058 = vmatprep.mubr.f32.mxu0 %v319_v51  ;;  %v328_v28 = vsub.f32 %v7985_v18, %v9696_v50  ;;  %v1670_v40 = vsub.f32 %v7988_v63, %v9697_v44 }
  0xcf   :  { %9924 = vst [vmem:[#allocation23_spill] sm:$0xff] %v8002_v9  ;;  %v152_v8 = vsel %vm117_vm3, %v7453_v39, 0  ;;  %v1494_v58 = vsel %vm117_vm3, %v7456_v25, 0  ;;  %6250 = vmatprep.mubr.f32.mxu1 %v1661_v59  ;;  %v8017_v25 = vsub.f32 %v149_v46, %v8000_v33  ;;  %v8020_v59 = vsub.f32 %v1491_v62, %v8002_v9 }
  0xd0   :  { %v7457_v17 = vpop.trf.xlu0  ;;  %v8012_v29 = vand.u32 4294901760, %v152_v8  ;;  %v8014_v55 = vand.u32 4294901760, %v1494_v58  ;;  %v329_v39 = vand.u32 4294901760, %v328_v28  ;;  %v1671_v6 = vand.u32 4294901760, %v1670_v40 }
  0xd1   :  { %v7461_v49 = vunpack.i.h.bf16 %v7457_v17  ;;  %v7458_v26 = vunpack.i.l.bf16 %v7457_v17  ;;  %9927 = vst [vmem:[#allocation26_spill] sm:$0xff] %v8017_v25  ;;  %9928 = vst [vmem:[#allocation27_spill] sm:$0xff] %v8020_v59  ;;  %v9708_v28 = vand.u32 4294901760, %v8017_v25  ;;  %v9711_v46 = vand.u32 4294901760, %v8020_v59 }
  0xd2   :  { %9925 = vst [vmem:[#allocation24_spill] sm:$0xff] %v8012_v29  ;;  %9926 = vst [vmem:[#allocation25_spill] sm:$0xff] %v8014_v55  ;;  %v8023_v51 = vsub.f32 %v152_v8, %v8012_v29  ;;  %v8026_v50 = vsub.f32 %v1494_v58, %v8014_v55  ;;  %6059 = vmatmul.mubr.f32.gmra.mrb[8].mxu0 %v329_v39  ;;  %6251 = vmatmul.mubr.f32.gmra.mrb[8].mxu1 %v1671_v6 }
  0xd3   :  { %v155_v44 = vsel %vm117_vm3, %v7458_v26, 0  ;;  %v1497_v63 = vsel %vm117_vm3, %v7461_v49, 0  ;;  %v338_v58 = vsub.f32 %v8017_v25, %v9708_v28  ;;  %v1680_v26 = vsub.f32 %v8020_v59, %v9711_v46 }
  0xd4   :  { %9929 = vst [vmem:[#allocation28_spill] sm:$0xff] %v8023_v51  ;;  %9930 = vst [vmem:[#allocation29_spill] sm:$0xff] %v8026_v50  ;;  %v7462_v17 = vpop.trf.xlu0  ;;  %v8032_v40 = vand.u32 4294901760, %v155_v44  ;;  %v8034_v62 = vand.u32 4294901760, %v1497_v63  ;;  %v9720_v6 = vand.u32 4294901760, %v8023_v51  ;;  %v9723_v49 = vand.u32 4294901760, %v8026_v50 }
  0xd5   :  { %v7466_v8 = vunpack.i.h.bf16 %v7462_v17  ;;  %v7463_v18 = vunpack.i.l.bf16 %v7462_v17  ;;  %v339_v48 = vand.u32 4294901760, %v338_v58  ;;  %v1681_v28 = vand.u32 4294901760, %v1680_v26 }
  0xd6   :  { %9931 = vst [vmem:[#allocation30_spill] sm:$0xff] %v8032_v40  ;;  %9932 = vst [vmem:[#allocation31_spill] sm:$0xff] %v8034_v62  ;;  %v8045_v39 = vsub.f32 %v155_v44, %v8032_v40  ;;  %v8048_v34 = vsub.f32 %v1497_v63, %v8034_v62  ;;  %v348_v46 = vsub.f32 %v8023_v51, %v9720_v6 }
  0xd7   :  { %v158_v17 = vsel %vm117_vm3, %v7463_v18, 0  ;;  %v1500_v5 = vsel %vm117_vm3, %v7466_v8, 0  ;;  %v1690_v59 = vsub.f32 %v8026_v50, %v9723_v49  ;;  %6061 = vmatprep.mubr.f32.mxu0 %v339_v48  ;;  %6253 = vmatprep.mubr.f32.mxu1 %v1681_v28 }
  0xd8   :  { %9933 = vst [vmem:[#allocation32_spill] sm:$0xff] %v8045_v39  ;;  %9934 = vst [vmem:[#allocation33_spill] sm:$0xff] %v8048_v34  ;;  %v7467_v25 = vpop.trf.xlu0  ;;  %v349_v63 = vand.u32 4294901760, %v348_v46  ;;  %v9728_v18 = vand.u32 4294901760, %v8045_v39  ;;  %v9731_v8 = vand.u32 4294901760, %v8048_v34  ;;  %v8062_v1 = vand.u32 4294901760, %v158_v17 }
  0xd9   :  { %v7471_v44 = vunpack.i.h.bf16 %v7467_v25  ;;  %v7468_v47 = vunpack.i.l.bf16 %v7467_v25  ;;  %v1691_v2 = vand.u32 4294901760, %v1690_v59  ;;  %v8064_v6 = vand.u32 4294901760, %v1500_v5 }
  0xda   :  { %9935 = vst [vmem:[#allocation34_spill] sm:$0xff] %v8062_v1  ;;  %6062 = vmatmul.mubr.f32.gmra.mrb[10].mxu0 %v349_v63  ;;  %v358_v25 = vsub.f32 %v8045_v39, %v9728_v18  ;;  %v1700_v59 = vsub.f32 %v8048_v34, %v9731_v8  ;;  %v8085_v18 = vsub.f32 %v158_v17, %v8062_v1 }
  0xdb   :  { %v1503_v58 = vsel %vm117_vm3, %v7471_v44, 0  ;;  %v161_v26 = vsel %vm117_vm3, %v7468_v47, 0  ;;  %9936 = vst [vmem:[#allocation35_spill] sm:$0xff] %v8064_v6  ;;  %6254 = vmatmul.mubr.f32.gmra.mrb[10].mxu1 %v1691_v2  ;;  %v8088_v39 = vsub.f32 %v1500_v5, %v8064_v6 }
  0xdc   :  { %v8066_v51 = vand.u32 4294901760, %v1503_v58  ;;  %v8068_v49 = vand.u32 4294901760, %v161_v26  ;;  %v7472_v48 = vpop.trf.xlu0  ;;  %v359_v50 = vand.u32 4294901760, %v358_v25  ;;  %v1701_v63 = vand.u32 4294901760, %v1700_v59 }
  0xdd   :  { %v7476_v47 = vunpack.i.h.bf16 %v7472_v48  ;;  %v7473_v28 = vunpack.i.l.bf16 %v7472_v48  ;;  %v9742_v25 = vand.u32 4294901760, %v8085_v18  ;;  %v9743_v59 = vand.u32 4294901760, %v8088_v39 }
  0xde   :  { %9937 = vst [vmem:[#allocation36_spill] sm:$0xff] %v8066_v51  ;;  %9938 = vst [vmem:[#allocation37_spill] sm:$0xff] %v8068_v49  ;;  %v8077_v46 = vsub.f32 %v1503_v58, %v8066_v51  ;;  %v8080_v44 = vsub.f32 %v161_v26, %v8068_v49  ;;  %6064 = vmatprep.mubr.f32.mxu0 %v359_v50  ;;  %6256 = vmatprep.mubr.f32.mxu1 %v1701_v63 }
  0xdf   :  { %v1506_v2 = vsel %vm117_vm3, %v7476_v47, 0  ;;  %v164_v0 = vsel %vm117_vm3, %v7473_v28, 0  ;;  %v368_v28 = vsub.f32 %v8085_v18, %v9742_v25  ;;  %v1710_v63 = vsub.f32 %v8088_v39, %v9743_v59 }
  0xe0   :  { %9939 = vst [vmem:[#allocation38_spill] sm:$0xff] %v8080_v44  ;;  %v8090_v8 = vand.u32 4294901760, %v1506_v2  ;;  %v8092_v48 = vand.u32 4294901760, %v164_v0  ;;  %v9736_v58 = vand.u32 4294901760, %v8080_v44  ;;  %v9741_v26 = vand.u32 4294901760, %v8077_v46 }
  0xe1   :  { %v1711_v22 = vand.u32 4294901760, %v1710_v63 }
  0xe2   :  { %9940 = vst [vmem:[#allocation39_spill] sm:$0xff] %v8090_v8  ;;  %9941 = vst [vmem:[#allocation40_spill] sm:$0xff] %v8092_v48  ;;  %v8099_v17 = vsub.f32 %v1506_v2, %v8090_v8  ;;  %v8102_v5 = vsub.f32 %v164_v0, %v8092_v48  ;;  %v378_v47 = vsub.f32 %v8080_v44, %v9736_v58  ;;  %v8116_v2 = vpop.trf.xlu1  ;;  %v369_v44 = vand.u32 4294901760, %v368_v28 }
  0xe3   :  { %v1720_v50 = vsub.f32 %v8077_v46, %v9741_v26  ;;  %6257 = vmatmul.mubr.f32.gmra.mrb[12].mxu1 %v1711_v22 }
  0xe4   :  { %v379_v0 = vand.u32 4294901760, %v378_v47  ;;  %v9745_v61 = vand.u32 4294901760, %v8102_v5  ;;  %v9744_v58 = vand.u32 4294901760, %v8099_v17  ;;  %6065 = vmatmul.mubr.f32.gmra.mrb[12].mxu0 %v369_v44 }
  0xe5   :  { %v1721_v34 = vand.u32 4294901760, %v1720_v50 }
  0xe6   :  { %v388_v26 = vsub.f32 %v8102_v5, %v9745_v61  ;;  %v1730_v25 = vsub.f32 %v8099_v17, %v9744_v58  ;;  %v8126_v59 = vpop.trf.xlu1  ;;  %6067 = vmatprep.mubr.f32.mxu0 %v379_v0  ;;  %v9955_v61 = vld [vmem:[#allocation7_spill] sm:$0xff] }
  0xe7   :  { %9942 = vst [vmem:[#allocation41_spill] sm:$0xff] %v8126_v59  ;;  %6259 = vmatprep.mubr.f32.mxu1 %v1721_v34  ;;  %v9987_v59 = vand.u32 4294901760, %v7845_v3 }
  0xe8   :  { %v389_v47 = vand.u32 4294901760, %v388_v26  ;;  %v1731_v50 = vand.u32 4294901760, %v1730_v25 }
  0xea   :  { %6068 = vmatmul.mubr.f32.gmra.mrb[14].mxu0 %v389_v47  ;;  %6260 = vmatmul.mubr.f32.gmra.mrb[14].mxu1 %v1731_v50  ;;  %v8128_v28 = vpop.trf.xlu1  ;;  %v9953_v47 = vand.u32 4294901760, %v7720_v37  ;;  %v9954_v50 = vand.u32 4294901760, %v7722_v38  ;;  %v9959_v37 = vld [vmem:[#allocation10_spill] sm:$0xff]  ;;  %v9960_v38 = vld [vmem:[#allocation11_spill] sm:$0xff] }
  0xeb   :  { %9943 = vst [vmem:[#allocation42_spill] sm:$0xff] %v8128_v28  ;;  %6078 = vmatprep.mubr.f32.mxu0 %v7798_v14  ;;  %6270 = vmatprep.mubr.f32.mxu1 %v7800_v20  ;;  %v9978_v28 = vld [vmem:[#allocation38_spill] sm:$0xff] }
  0xec   :  { %v6838_v58 = vpack.c.bf16 %v9954_v50, %v9953_v47  ;;  %v9962_v50 = vld [vmem:[#allocation12_spill] sm:$0xff] }
  0xee   :  { %6079 = vmatmul.mubr.f32.vlgmr.msra.gmra.mrb[0].mxu0 %v7812_v30  ;;  %6271 = vmatmul.mubr.f32.vlgmr.msra.gmra.mrb[0].mxu1 %v7814_v32  ;;  %v8134_v44 = vpop.trf.xlu1 }
  0xef   :  { %9944 = vst [vmem:[#allocation43_spill] sm:$0xff] %v8134_v44  ;;  %6825 = vmatpush3.bf16.msra.mxu0 %v7790_v10  ;;  %6081 = vmatprep.mubr.f32.mxu0 %v7838_v56 }
  0xf0   :  { %6273 = vmatprep.mubr.f32.mxu1 %v7840_v57  ;;  %6873 = vmatpush3.bf16.msra.mxu1 %v7790_v10 }
  0xf1   :  { %6827 = vmatprep.subr.bf16.mxu0 %v7794_v12  ;;  %6875 = vmatprep.subr.bf16.mxu1 %v7794_v12 }
  0xf2   :  { %6082 = vmatmul.mubr.f32.gmra.mrb[2].mxu0 %v7852_v11  ;;  %6274 = vmatmul.mubr.f32.gmra.mrb[2].mxu1 %v7854_v13  ;;  %v8144_v22 = vpop.trf.xlu1 }
  0xf3   :  { %9945 = vst [vmem:[#allocation44_spill] sm:$0xff] %v8144_v22  ;;  %6084 = vmatprep.mubr.f32.mxu0 %v7876_v35  ;;  %6276 = vmatprep.mubr.f32.mxu1 %v7878_v41  ;;  %v9968_v22 = vld [vmem:[#allocation17_spill] sm:$0xff] }
  0xf4   :  { %6829 = vmatpush3.bf16.msra.mxu0 %v7794_v12  ;;  %6877 = vmatpush3.bf16.msra.mxu1 %v7794_v12 }
  0xf5   :  { %6831 = vmatprep.subr.bf16.mxu0 %v7702_v31  ;;  %6879 = vmatprep.subr.bf16.mxu1 %v7702_v31 }
  0xf6   :  { %6085 = vmatmul.mubr.f32.gmra.mrb[4].mxu0 %v7890_v52  ;;  %6277 = vmatmul.mubr.f32.gmra.mrb[4].mxu1 %v7892_v53  ;;  %v8154_v10 = vpop.trf.xlu1 }
  0xf7   :  { %9946 = vst [vmem:[#allocation45_spill] sm:$0xff] %v8154_v10  ;;  %6087 = vmatprep.mubr.f32.mxu0 %v7912_v19  ;;  %6279 = vmatprep.mubr.f32.mxu1 %v7914_v16  ;;  %v9967_v10 = vld [vmem:[#allocation16_spill] sm:$0xff] }
  0xfa   :  { %6088 = vmatmul.mubr.f32.gmra.mrb[6].mxu0 %v7940_v45  ;;  %6280 = vmatmul.mubr.f32.gmra.mrb[6].mxu1 %v7942_v27  ;;  %v8160_v34 = vpop.trf.xlu1 }
  0xfb   :  { %9947 = vst [vmem:[#allocation46_spill] sm:$0xff] %v8160_v34  ;;  %6090 = vmatprep.mubr.f32.mxu0 %v7952_v7  ;;  %6282 = vmatprep.mubr.f32.mxu1 %v7954_v60 }
  0xfe   :  { %6091 = vmatmul.mubr.f32.gmra.mrb[8].mxu0 %v7972_v15  ;;  %6283 = vmatmul.mubr.f32.gmra.mrb[8].mxu1 %v7974_v54  ;;  %v8166_v12 = vpop.trf.xlu1  ;;  %v9985_v54 = vand.u32 4294901760, %v7823_v42  ;;  %v9986_v15 = vand.u32 4294901760, %v7826_v43 }
  0xff   :  { %9948 = vst [vmem:[#allocation47_spill] sm:$0xff] %v8166_v12  ;;  %6093 = vmatprep.mubr.f32.mxu0 %v8000_v33  ;;  %6285 = vmatprep.mubr.f32.mxu1 %v8002_v9  ;;  %v9965_v12 = vld [vmem:[#allocation15_spill] sm:$0xff] }
 0x102   :  { %6094 = vmatmul.mubr.f32.gmra.mrb[10].mxu0 %v8012_v29  ;;  %6286 = vmatmul.mubr.f32.gmra.mrb[10].mxu1 %v8014_v55  ;;  %v8172_v26 = vpop.trf.xlu1  ;;  %v9983_v29 = vld [vmem:[#allocation6_spill] sm:$0xff] }
 0x103   :  { %9949 = vst [vmem:[#allocation48_spill] sm:$0xff] %v8172_v26  ;;  %6096 = vmatprep.mubr.f32.mxu0 %v8032_v40  ;;  %6288 = vmatprep.mubr.f32.mxu1 %v8034_v62  ;;  %v9963_v26 = vld [vmem:[#allocation13_spill] sm:$0xff]  ;;  %v9980_v62 = vand.u32 4294901760, %v7806_v24  ;;  %v9984_v9 = vand.u32 4294901760, %v9983_v29  ;;  %v10000_v29 = vand.u32 4294901760, %v9968_v22 }
 0x104   :  { %v9981_v40 = vld [vmem:[#allocation5_spill] sm:$0xff] }
 0x105   :  { %v9982_v55 = vand.u32 4294901760, %v9981_v40 }
 0x106   :  { %6097 = vmatmul.mubr.f32.gmra.mrb[12].mxu0 %v8062_v1  ;;  %6289 = vmatmul.mubr.f32.gmra.mrb[12].mxu1 %v8064_v6  ;;  %v8178_v25 = vpop.trf.xlu1  ;;  %v9975_v6 = vld [vmem:[#allocation29_spill] sm:$0xff]  ;;  %v9976_v1 = vld [vmem:[#allocation32_spill] sm:$0xff] }
 0x107   :  { %9950 = vst [vmem:[#allocation49_spill] sm:$0xff] %v8178_v25  ;;  %6099 = vmatprep.mubr.f32.mxu0 %v8068_v49  ;;  %6291 = vmatprep.mubr.f32.mxu1 %v8066_v51  ;;  %v9958_v25 = vld [vmem:[#allocation9_spill] sm:$0xff]  ;;  %v9973_v51 = vld [vmem:[#allocation27_spill] sm:$0xff]  ;;  %v9974_v49 = vld [vmem:[#allocation28_spill] sm:$0xff]  ;;  %v6842_v33 = vpack.c.bf16 %v9984_v9, %v9982_v55  ;;  %v9990_v9 = vand.u32 4294901760, %v9955_v61 }
 0x10a   :  { %6100 = vmatmul.mubr.f32.gmra.mrb[14].mxu0 %v8092_v48  ;;  %6292 = vmatmul.mubr.f32.gmra.mrb[14].mxu1 %v8090_v8  ;;  %v8184_v63 = vpop.trf.xlu1  ;;  %v9969_v8 = vld [vmem:[#allocation20_spill] sm:$0xff]  ;;  %v9970_v48 = vld [vmem:[#allocation21_spill] sm:$0xff] }
 0x10b   :  { %9951 = vst [vmem:[#allocation50_spill] sm:$0xff] %v8184_v63  ;;  %6110 = vmatprep.mubr.f32.mxu0 %v7803_v23  ;;  %6302 = vmatprep.mubr.f32.mxu1 %v7806_v24  ;;  %v9957_v63 = vld [vmem:[#allocation8_spill] sm:$0xff]  ;;  %v9989_v24 = vand.u32 4294901760, %v7867_v21  ;;  %v10001_v55 = vand.u32 4294901760, %v9969_v8  ;;  %v10002_v40 = vand.u32 4294901760, %v9970_v48 }
 0x10e   :  { %6111 = vmatmul.mubr.f32.vlgmr.msra.gmra.mrb[0].mxu0 %v7823_v42  ;;  %6303 = vmatmul.mubr.f32.vlgmr.msra.gmra.mrb[0].mxu1 %v7826_v43  ;;  %v8190_v0 = vpop.trf.xlu1  ;;  %v9991_v42 = vand.u32 4294901760, %v9957_v63  ;;  %v9992_v43 = vand.u32 4294901760, %v9958_v25 }
 0x10f   :  { %9952 = vst [vmem:[#allocation51_spill] sm:$0xff] %v8190_v0  ;;  %6833 = vmatpush3.bf16.msra.mxu0 %v7702_v31  ;;  %6113 = vmatprep.mubr.f32.mxu0 %v7845_v3  ;;  %v9993_v3 = vand.u32 4294901760, %v9959_v37 }
 0x110   :  { %6305 = vmatprep.mubr.f32.mxu1 %v7848_v4  ;;  %6881 = vmatpush3.bf16.msra.mxu1 %v7702_v31 }
 0x111   :  { %6835 = vmatprep.subr.bf16.mxu0 %v7714_v36  ;;  %6883 = vmatprep.subr.bf16.mxu1 %v7714_v36 }
 0x112   :  { %6114 = vmatmul.mubr.f32.gmra.mrb[2].mxu0 %v7867_v21  ;;  %6306 = vmatmul.mubr.f32.gmra.mrb[2].mxu1 %v9955_v61  ;;  %v8204_v0 = vpop.trf.xlu1  ;;  %v9995_v21 = vand.u32 4294901760, %v9962_v50  ;;  %v9996_v61 = vand.u32 4294901760, %v9963_v26 }
 0x113   :  { %9956 = vst [vmem:[#allocation7_spill] sm:$0xff] %v8204_v0  ;;  %6116 = vmatprep.mubr.f32.mxu0 %v9957_v63  ;;  %6308 = vmatprep.mubr.f32.mxu1 %v9958_v25  ;;  %v9964_v0 = vld [vmem:[#allocation14_spill] sm:$0xff]  ;;  %v10017_v25 = vld [vmem:[#allocation41_spill] sm:$0xff] }
 0x114   :  { %6837 = vmatpush3.bf16.msra.mxu0 %v7714_v36  ;;  %6885 = vmatpush3.bf16.msra.mxu1 %v7714_v36  ;;  %v7494_v63 = vunpack.i.h.bf16 %v10017_v25 }
 0x115   :  { %6839 = vmatprep.subr.bf16.mxu0 %v6838_v58  ;;  %6887 = vmatprep.subr.bf16.mxu1 %v6838_v58 }
 0x116   :  { %6117 = vmatmul.mubr.f32.gmra.mrb[4].mxu0 %v9959_v37  ;;  %6309 = vmatmul.mubr.f32.gmra.mrb[4].mxu1 %v9960_v38  ;;  %v8212_v47 = vpop.trf.xlu1  ;;  %v8366_v37 = vld [vmem:[#allocation2 + $0x38] sm:$0xff] }
 0x117   :  { %9961 = vst [vmem:[#allocation8_spill] sm:$0xff] %v8212_v47  ;;  %6119 = vmatprep.mubr.f32.mxu0 %v9962_v50  ;;  %6311 = vmatprep.mubr.f32.mxu1 %v9963_v26  ;;  %v9972_v47 = vld [vmem:[#allocation26_spill] sm:$0xff]  ;;  %v7489_v26 = vunpack.i.h.bf16 %v8116_v2  ;;  %10018 = vst [vmem:[#allocation13_spill] sm:$0xff] %v8366_v37 }
 0x118   :  { %v10021_v50 = vld [vmem:[#allocation22_spill] sm:$0xff] }
 0x11a   :  { %6120 = vmatmul.mubr.f32.gmra.mrb[6].mxu0 %v9964_v0  ;;  %6312 = vmatmul.mubr.f32.gmra.mrb[6].mxu1 %v9965_v12  ;;  %v8218_v34 = vpop.trf.xlu1 }
 0x11b   :  { %9966 = vst [vmem:[#allocation9_spill] sm:$0xff] %v8218_v34  ;;  %6122 = vmatprep.mubr.f32.mxu0 %v9967_v10  ;;  %6314 = vmatprep.mubr.f32.mxu1 %v9968_v22  ;;  %v9977_v34 = vld [vmem:[#allocation33_spill] sm:$0xff]  ;;  %v10007_v22 = vand.u32 4294901760, %v9976_v1 }
 0x11e   :  { %6123 = vmatmul.mubr.f32.gmra.mrb[8].mxu0 %v9969_v8  ;;  %6315 = vmatmul.mubr.f32.gmra.mrb[8].mxu1 %v9970_v48  ;;  %v8224_v44 = vpop.trf.xlu1  ;;  %v10008_v8 = vand.u32 4294901760, %v9977_v34  ;;  %v10009_v48 = vand.u32 4294901760, %v8085_v18 }
 0x11f   :  { %9971 = vst [vmem:[#allocation10_spill] sm:$0xff] %v8224_v44  ;;  %6125 = vmatprep.mubr.f32.mxu0 %v9972_v47  ;;  %6317 = vmatprep.mubr.f32.mxu1 %v9973_v51  ;;  %v9979_v44 = vand.u32 4294901760, %v7803_v23  ;;  %v9988_v23 = vand.u32 4294901760, %v7848_v4  ;;  %v9994_v4 = vand.u32 4294901760, %v9960_v38  ;;  %v10019_v38 = vld [vmem:[#allocation18_spill] sm:$0xff] }
 0x122   :  { %6126 = vmatmul.mubr.f32.gmra.mrb[10].mxu0 %v9974_v49  ;;  %6318 = vmatmul.mubr.f32.gmra.mrb[10].mxu1 %v9975_v6 }
 0x123   :  { %6128 = vmatprep.mubr.f32.mxu0 %v9976_v1  ;;  %6320 = vmatprep.mubr.f32.mxu1 %v9977_v34  ;;  %v10014_v1 = vand.u32 4294901760, %v8099_v17  ;;  %v8314_v34 = vld [vmem:[#allocation2 + $0x8] sm:$0xff] }
 0x124   :  { %1414 = vrot.lane.b32.xlu1 %v8314_v34, %s7609_s25 }
 0x126   :  { %6129 = vmatmul.mubr.f32.gmra.mrb[12].mxu0 %v8085_v18  ;;  %6321 = vmatmul.mubr.f32.gmra.mrb[12].mxu1 %v8088_v39  ;;  %v2751_v18 = vld [vmem:[%s9665_s1] sm:$0xff] }
 0x127   :  { %6131 = vmatprep.mubr.f32.mxu0 %v9978_v28  ;;  %6323 = vmatprep.mubr.f32.mxu1 %v8077_v46 }
 0x12a   :  { %6132 = vmatmul.mubr.f32.gmra.mrb[14].mxu0 %v8102_v5  ;;  %6324 = vmatmul.mubr.f32.gmra.mrb[14].mxu1 %v8099_v17 }
 0x12b   :  { %6142 = vmatprep.mubr.f32.mxu0 %v9979_v44  ;;  %6334 = vmatprep.mubr.f32.mxu1 %v9980_v62  ;;  %v10003_v62 = vand.u32 4294901760, %v9972_v47  ;;  %v10006_v44 = vand.u32 4294901760, %v9975_v6  ;;  %v10013_v6 = vand.u32 4294901760, %v8102_v5  ;;  %v10020_v47 = vld [vmem:[#allocation19_spill] sm:$0xff] }
 0x12e   :  { %6143 = vmatmul.mubr.f32.vlgmr.msra.gmra.mrb[0].mxu0 %v9985_v54  ;;  %6335 = vmatmul.mubr.f32.vlgmr.msra.gmra.mrb[0].mxu1 %v9986_v15  ;;  %v9997_v15 = vand.u32 4294901760, %v9964_v0  ;;  %v9998_v54 = vand.u32 4294901760, %v9965_v12  ;;  %v8352_v12 = vld [vmem:[#allocation2 + $0x28] sm:$0xff]  ;;  %v8364_v0 = vld [vmem:[#allocation2 + $0x20] sm:$0xff] }
 0x12f   :  { %6841 = vmatpush3.bf16.msra.mxu0 %v6838_v58  ;;  %6145 = vmatprep.mubr.f32.mxu0 %v9987_v59  ;;  %v10005_v59 = vand.u32 4294901760, %v9974_v49  ;;  %v10012_v49 = vand.u32 4294901760, %v8077_v46  ;;  %v2916_v46 = vand.u32 4294901760, %v2751_v18  ;;  %10016 = vst [vmem:[#allocation12_spill] sm:$0xff] %v8352_v12 }
 0x130   :  { %6337 = vmatprep.mubr.f32.mxu1 %v9988_v23  ;;  %6889 = vmatpush3.bf16.msra.mxu1 %v6838_v58  ;;  %v10004_v58 = vand.u32 4294901760, %v9973_v51  ;;  %v10011_v51 = vand.u32 4294901760, %v9978_v28  ;;  %v8340_v28 = vld [vmem:[#allocation2] sm:$0xff]  ;;  %v10022_v23 = vld [vmem:[#allocation23_spill] sm:$0xff] }
 0x131   :  { %6843 = vmatprep.subr.bf16.mxu0 %v6842_v33  ;;  %6891 = vmatprep.subr.bf16.mxu1 %v6842_v33 }
 0x132   :  { %6146 = vmatmul.mubr.f32.gmra.mrb[2].mxu0 %v9989_v24  ;;  %6338 = vmatmul.mubr.f32.gmra.mrb[2].mxu1 %v9990_v9  ;;  %v7491_v24 = vunpack.i.l.bf16 %v10017_v25  ;;  %v7486_v9 = vunpack.i.l.bf16 %v8116_v2  ;;  %v10028_v2 = vld [vmem:[#allocation25_spill] sm:$0xff] }
 0x133   :  { %6148 = vmatprep.mubr.f32.mxu0 %v9991_v42  ;;  %6340 = vmatprep.mubr.f32.mxu1 %v9992_v43  ;;  %v4275_v42 = vsel %vm117_vm3, %v7489_v26, 0  ;;  %v4278_v43 = vsel %vm117_vm3, %v7494_v63, 0 }
 0x134   :  { %6845 = vmatpush3.bf16.msra.mxu0 %v6842_v33  ;;  %6893 = vmatpush3.bf16.msra.mxu1 %v6842_v33  ;;  %v9999_v33 = vand.u32 4294901760, %v9967_v10  ;;  %v10010_v10 = vand.u32 4294901760, %v8088_v39  ;;  %v2752_v39 = vld [vmem:[%s9665_s1 + $0x8] sm:$0xff] }
 0x135   :  { %6847 = vmatprep.subr.bf16.mxu0 %v7702_v31  ;;  %6895 = vmatprep.subr.bf16.mxu1 %v7702_v31  ;;  %v2919_v17 = vand.u32 4294901760, %v2752_v39 }
 0x136   :  { %6149 = vmatmul.mubr.f32.gmra.mrb[4].mxu0 %v9993_v3  ;;  %6341 = vmatmul.mubr.f32.gmra.mrb[4].mxu1 %v9994_v4  ;;  %v8380_v3 = vsub.f32 %v2751_v18, %v2916_v46 }
 0x137   :  { %6151 = vmatprep.mubr.f32.mxu0 %v9995_v21  ;;  %6343 = vmatprep.mubr.f32.mxu1 %v9996_v61  ;;  %v8328_v5 = vpack.c.bf16 %v2919_v17, %v2916_v46  ;;  %v8382_v4 = vsub.f32 %v2752_v39, %v2919_v17  ;;  %v8384_v21 = vld [vmem:[#allocation2 + $0x30] sm:$0xff]  ;;  %v8386_v61 = vld [vmem:[#allocation2 + $0x48] sm:$0xff]  ;;  %v10039_v39 = vld [vmem:[#allocation37_spill] sm:$0xff] }
 0x138   :  { %1412 = vrot.lane.b32.xlu0 %v8340_v28, %s7609_s25  ;;  %10023 = vst [vmem:[#allocation14_spill] sm:$0xff] %v8380_v3  ;;  %10025 = vst [vmem:[#allocation16_spill] sm:$0xff] %v8384_v21  ;;  %v10040_v46 = vld [vmem:[#allocation36_spill] sm:$0xff]  ;;  %v10041_v17 = vld [vmem:[#allocation43_spill] sm:$0xff] }
 0x139   :  { %10015 = vst [vmem:[#allocation11_spill] sm:$0xff] %v8328_v5  ;;  %10024 = vst [vmem:[#allocation15_spill] sm:$0xff] %v8382_v4  ;;  %v7501_v26 = vunpack.i.l.bf16 %v10041_v17 }
 0x13a   :  { %6152 = vmatmul.mubr.f32.gmra.mrb[6].mxu0 %v9997_v15  ;;  %6344 = vmatmul.mubr.f32.gmra.mrb[6].mxu1 %v9998_v54  ;;  %10026 = vst [vmem:[#allocation17_spill] sm:$0xff] %v8386_v61  ;;  %v10027_v15 = vld [vmem:[#allocation24_spill] sm:$0xff]  ;;  %v2871_v54 = vsel %vm117_vm3, %v7491_v24, 0 }
 0x13b   :  { %6154 = vmatprep.mubr.f32.mxu0 %v9999_v33  ;;  %6346 = vmatprep.mubr.f32.mxu1 %v10000_v29  ;;  %v10029_v33 = vld [vmem:[#allocation30_spill] sm:$0xff]  ;;  %v10030_v29 = vld [vmem:[#allocation31_spill] sm:$0xff] }
 0x13c   :  { %1422 = vrot.lane.b32.xlu0 %v8352_v12, %s7609_s25 }
 0x13e   :  { %6155 = vmatmul.mubr.f32.gmra.mrb[8].mxu0 %v10001_v55  ;;  %6347 = vmatmul.mubr.f32.gmra.mrb[8].mxu1 %v10002_v40  ;;  %v8393_v55 = vand.u32 4294901760, %v4275_v42  ;;  %v8395_v40 = vand.u32 4294901760, %v4278_v43 }
 0x13f   :  { %6157 = vmatprep.mubr.f32.mxu0 %v10003_v62  ;;  %6349 = vmatprep.mubr.f32.mxu1 %v10004_v58  ;;  %v10033_v62 = vld [vmem:[#allocation42_spill] sm:$0xff] }
 0x140   :  { %1426 = vrot.lane.b32.xlu0 %v8366_v37, %s7609_s25  ;;  %10031 = vst [vmem:[#allocation20_spill] sm:$0xff] %v8393_v55  ;;  %10032 = vst [vmem:[#allocation21_spill] sm:$0xff] %v8395_v40  ;;  %v7499_v58 = vunpack.i.h.bf16 %v10033_v62  ;;  %v7496_v18 = vunpack.i.l.bf16 %v10033_v62  ;;  %v8430_v63 = vsub.f32 %v4275_v42, %v8393_v55  ;;  %v8433_v24 = vsub.f32 %v4278_v43, %v8395_v40  ;;  %v8449_v40 = vld [vmem:[#allocation2 + $0x50] sm:$0xff] }
 0x141   :  { %v10045_v42 = vand.u32 4294901760, %v8380_v3  ;;  %v10046_v43 = vand.u32 4294901760, %v8382_v4  ;;  %10047 = vst [vmem:[#allocation38_spill] sm:$0xff] %v8449_v40  ;;  %v10051_v62 = vld [vmem:[#allocation39_spill] sm:$0xff] }
 0x142   :  { %6158 = vmatmul.mubr.f32.gmra.mrb[10].mxu0 %v10005_v59  ;;  %6350 = vmatmul.mubr.f32.gmra.mrb[10].mxu1 %v10006_v44  ;;  %v2868_v59 = vsel %vm117_vm3, %v7486_v9, 0  ;;  %10043 = vst [vmem:[#allocation32_spill] sm:$0xff] %v8430_v63  ;;  %10044 = vst [vmem:[#allocation33_spill] sm:$0xff] %v8433_v24  ;;  %v7504_v9 = vunpack.i.h.bf16 %v10041_v17  ;;  %v2874_v44 = vsel %vm117_vm3, %v7496_v18, 0 }
 0x143   :  { %6160 = vmatprep.mubr.f32.mxu0 %v10007_v22  ;;  %6352 = vmatprep.mubr.f32.mxu1 %v10008_v8  ;;  %v8405_v8 = vld [vmem:[#allocation2 + $0x40] sm:$0xff]  ;;  %v8427_v25 = vand.u32 4294901760, %v2868_v59  ;;  %v4281_v22 = vsel %vm117_vm3, %v7499_v58, 0  ;;  %v3148_v55 = vsub.f32 %v8380_v3, %v10045_v42  ;;  %v3155_v17 = vsub.f32 %v8382_v4, %v10046_v43  ;;  %v8451_v58 = vld [vmem:[#allocation2 + $0x68] sm:$0xff] }
 0x144   :  { %1430 = vrot.lane.b32.xlu0 %v8386_v61, %s7609_s25  ;;  %10034 = vst [vmem:[#allocation26_spill] sm:$0xff] %v8405_v8  ;;  %10048 = vst [vmem:[#allocation5_spill] sm:$0xff] %v8451_v58  ;;  %v2877_v61 = vsel %vm117_vm3, %v7501_v26, 0  ;;  %v8468_v37 = vand.u32 4294901760, %v4281_v22  ;;  %v4284_v4 = vsel %vm117_vm3, %v7504_v9, 0  ;;  %v10057_v9 = vld [vmem:[#allocation45_spill] sm:$0xff] }
 0x145   :  { %10042 = vst [vmem:[#allocation29_spill] sm:$0xff] %v8427_v25  ;;  %v8461_v42 = vsub.f32 %v2868_v59, %v8427_v25  ;;  %v3149_v26 = vand.u32 4294901760, %v3148_v55  ;;  %v7514_v43 = vunpack.i.h.bf16 %v10057_v9  ;;  %v7511_v25 = vunpack.i.l.bf16 %v10057_v9 }
 0x146   :  { %6161 = vmatmul.mubr.f32.gmra.mrb[12].mxu0 %v10009_v48  ;;  %6353 = vmatmul.mubr.f32.gmra.mrb[12].mxu1 %v10010_v10  ;;  %v8407_v48 = vld [vmem:[#allocation2 + $0x58] sm:$0xff]  ;;  %v8409_v10 = vand.u32 4294901760, %v2871_v54  ;;  %v8493_v55 = vand.u32 4294901760, %v4284_v4  ;;  %v10061_v9 = vand.u32 4294901760, %v8433_v24 }
 0x147   :  { %6163 = vmatprep.mubr.f32.mxu0 %v10011_v51  ;;  %6355 = vmatprep.mubr.f32.mxu1 %v10012_v49  ;;  %10035 = vst [vmem:[#allocation27_spill] sm:$0xff] %v8407_v48  ;;  %v10037_v51 = vld [vmem:[#allocation34_spill] sm:$0xff]  ;;  %v10038_v49 = vld [vmem:[#allocation35_spill] sm:$0xff]  ;;  %10052 = vst [vmem:[#allocation41_spill] sm:$0xff] %v8461_v42 }
 0x148   :  { %10036 = vst [vmem:[#allocation28_spill] sm:$0xff] %v8409_v10  ;;  %1434 = vrot.lane.b32.xlu0 %v8407_v48, %s7609_s25  ;;  %v10050_v48 = vld [vmem:[#allocation40_spill] sm:$0xff]  ;;  %10058 = vst [vmem:[#allocation19_spill] sm:$0xff] %v8493_v55 }
 0x14a   :  { %6164 = vmatmul.mubr.f32.gmra.mrb[14].mxu0 %v10013_v6  ;;  %6356 = vmatmul.mubr.f32.gmra.mrb[14].mxu1 %v10014_v1  ;;  %v8416_v6 = vld [vmem:[%s9665_s1 + $0x10] sm:$0xff]  ;;  %v8421_v1 = vld [vmem:[%s9665_s1 + $0x18] sm:$0xff]  ;;  %s7610_s1 = smov 64  }
 0x14b   :  { %6174 = vmatprep.mubr.f32.mxu0 %v7798_v14  ;;  %6366 = vmatprep.mubr.f32.mxu1 %v7800_v20  ;;  %v10055_v59 = vand.u32 4294901760, %v8421_v1 }
 0x14c   :  { %1438 = vrot.lane.b32.xlu0 %v8451_v58, %s7609_s25  ;;  %v8488_v58 = vand.u32 4294901760, %v2877_v61 }
 0x14e   :  { %6175 = vmatmul.mubr.f32.vlgmr.msra.gmra.mrb[0].mxu0 %v7812_v30  ;;  %6367 = vmatmul.mubr.f32.vlgmr.msra.gmra.mrb[0].mxu1 %v7814_v32 }
 0x14f   :  { %6849 = vmatpush3.bf16.msra.mxu0 %v7702_v31  ;;  %6177 = vmatprep.mubr.f32.mxu0 %v7838_v56 }
 0x150   :  { %6369 = vmatprep.mubr.f32.mxu1 %v7840_v57  ;;  %6897 = vmatpush3.bf16.msra.mxu1 %v7702_v31  ;;  %v8338_v31 = vld [vmem:[#allocation2 + $0x10] sm:$0xff] }
 0x151   :  { %6851 = vmatprep.subr.bf16.mxu0 %v7714_v36  ;;  %6899 = vmatprep.subr.bf16.mxu1 %v7714_v36 }
 0x152   :  { %6178 = vmatmul.mubr.f32.gmra.mrb[2].mxu0 %v7852_v11  ;;  %6370 = vmatmul.mubr.f32.gmra.mrb[2].mxu1 %v7854_v13 }
 0x153   :  { %6180 = vmatprep.mubr.f32.mxu0 %v7876_v35  ;;  %6372 = vmatprep.mubr.f32.mxu1 %v7878_v41 }
 0x154   :  { %6853 = vmatpush3.bf16.msra.mxu0 %v7714_v36  ;;  %6901 = vmatpush3.bf16.msra.mxu1 %v7714_v36  ;;  %v8350_v36 = vld [vmem:[#allocation2 + $0x18] sm:$0xff] }
 0x155   :  { %6903 = vmatprep.subr.bf16.mxu0 %v8328_v5  ;;  %6951 = vmatprep.subr.bf16.mxu1 %v8328_v5 }
 0x156   :  { %6181 = vmatmul.mubr.f32.gmra.mrb[4].mxu0 %v7890_v52  ;;  %6373 = vmatmul.mubr.f32.gmra.mrb[4].mxu1 %v7892_v53 }
 0x157   :  { %6183 = vmatprep.mubr.f32.mxu0 %v7912_v19  ;;  %6375 = vmatprep.mubr.f32.mxu1 %v7914_v16 }
 0x158   :  { %1416 = vrot.lane.b32.xlu1 %v8338_v31, %s7609_s25 }
 0x15a   :  { %6184 = vmatmul.mubr.f32.gmra.mrb[6].mxu0 %v7940_v45  ;;  %6376 = vmatmul.mubr.f32.gmra.mrb[6].mxu1 %v7942_v27 }
 0x15b   :  { %6186 = vmatprep.mubr.f32.mxu0 %v7952_v7  ;;  %6378 = vmatprep.mubr.f32.mxu1 %v7954_v60 }
 0x15c   :  { %1418 = vrot.lane.b32.xlu1 %v8350_v36, %s7609_s25 }
 0x15e   :  { %6187 = vmatmul.mubr.f32.gmra.mrb[8].mxu0 %v10019_v38  ;;  %6379 = vmatmul.mubr.f32.gmra.mrb[8].mxu1 %v10020_v47 }
 0x15f   :  { %6189 = vmatprep.mubr.f32.mxu0 %v10021_v50  ;;  %6381 = vmatprep.mubr.f32.mxu1 %v10022_v23 }
 0x160   :  { %1420 = vrot.lane.b32.xlu1 %v8364_v0, %s7609_s25 }
 0x162   :  { %6190 = vmatmul.mubr.f32.gmra.mrb[10].mxu0 %v10027_v15  ;;  %6382 = vmatmul.mubr.f32.gmra.mrb[10].mxu1 %v10028_v2 }
 0x163   :  { %6192 = vmatprep.mubr.f32.mxu0 %v10029_v33  ;;  %6384 = vmatprep.mubr.f32.mxu1 %v10030_v29 }
 0x164   :  { %1424 = vrot.lane.b32.xlu1 %v8384_v21, %s7609_s25  ;;  %v10053_v21 = vld [vmem:[#allocation44_spill] sm:$0xff] }
 0x166   :  { %6193 = vmatmul.mubr.f32.gmra.mrb[12].mxu0 %v10037_v51  ;;  %6385 = vmatmul.mubr.f32.gmra.mrb[12].mxu1 %v10038_v49 }
 0x167   :  { %6195 = vmatprep.mubr.f32.mxu0 %v10039_v39  ;;  %6387 = vmatprep.mubr.f32.mxu1 %v10040_v46 }
 0x168   :  { %1428 = vrot.lane.b32.xlu1 %v8405_v8, %s7609_s25  ;;  %v8454_v8 = vsub.f32 %v2871_v54, %v8409_v10  ;;  %v7509_v54 = vunpack.i.h.bf16 %v10053_v21  ;;  %v3156_v10 = vand.u32 4294901760, %v3155_v17  ;;  %v10060_v17 = vand.u32 4294901760, %v8430_v63 }
 0x16a   :  { %10049 = vst [vmem:[#allocation6_spill] sm:$0xff] %v8454_v8  ;;  %6196 = vmatmul.mubr.f32.gmra.mrb[14].mxu0 %v10050_v48  ;;  %6388 = vmatmul.mubr.f32.gmra.mrb[14].mxu1 %v10051_v62 }
 0x16b   :  { %6206 = vmatprep.mubr.f32.mxu0 %v7798_v14  ;;  %6398 = vmatprep.mubr.f32.mxu1 %v7800_v20  ;;  %v7506_v14 = vunpack.i.l.bf16 %v10053_v21  ;;  %v10054_v20 = vand.u32 4294901760, %v8416_v6  ;;  %v8514_v21 = vsub.f32 %v4281_v22, %v8468_v37 }
 0x16c   :  { %1432 = vrot.lane.b32.xlu1 %v8449_v40, %s7609_s25  ;;  %v8486_v40 = vand.u32 4294901760, %v2874_v44 }
 0x16d   :  { %v8480_v18 = vpack.c.bf16 %v10055_v59, %v10054_v20  ;;  %v8501_v20 = vsub.f32 %v8430_v63, %v10060_v17  ;;  %10062 = vst [vmem:[#allocation22_spill] sm:$0xff] %v8514_v21  ;;  %v4287_v17 = vsel %vm117_vm3, %v7509_v54, 0  ;;  %v8524_v59 = vsub.f32 %v2877_v61, %v8488_v58  ;;  %v10065_v54 = vld [vmem:[#allocation47_spill] sm:$0xff] }
 0x16e   :  { %6207 = vmatmul.mubr.f32.vlgmr.msra.gmra.mrb[0].mxu0 %v7812_v30  ;;  %6399 = vmatmul.mubr.f32.vlgmr.msra.gmra.mrb[0].mxu1 %v7814_v32  ;;  %v10059_v30 = vld [vmem:[#allocation46_spill] sm:$0xff]  ;;  %v8538_v61 = vsub.f32 %v4284_v4, %v8493_v55  ;;  %v10070_v55 = vld [vmem:[#allocation48_spill] sm:$0xff] }
 0x16f   :  { %10056 = vst [vmem:[#allocation18_spill] sm:$0xff] %v8480_v18  ;;  %6905 = vmatpush3.bf16.msra.mxu0 %v8328_v5  ;;  %6209 = vmatprep.mubr.f32.mxu0 %v7838_v56  ;;  %v7516_v32 = vunpack.i.l.bf16 %v10059_v30  ;;  %v8507_v56 = vsub.f32 %v8433_v24, %v10061_v9  ;;  %v8521_v9 = vsub.f32 %v2874_v44, %v8486_v40  ;;  %10064 = vst [vmem:[#allocation24_spill] sm:$0xff] %v8524_v59  ;;  %v8562_v24 = vld [vmem:[#allocation2 + $0x78] sm:$0xff] }
 0x170   :  { %6401 = vmatprep.mubr.f32.mxu1 %v7840_v57  ;;  %6953 = vmatpush3.bf16.msra.mxu1 %v8328_v5  ;;  %v8511_v57 = vpack.c.bf16 %v3156_v10, %v3149_v26  ;;  %v2880_v5 = vsel %vm117_vm3, %v7506_v14, 0  ;;  %v2883_v10 = vsel %vm117_vm3, %v7511_v25, 0  ;;  %v4290_v26 = vsel %vm117_vm3, %v7514_v43, 0  ;;  %10067 = vst [vmem:[#allocation25_spill] sm:$0xff] %v8538_v61 }
 0x171   :  { %6907 = vmatprep.subr.bf16.mxu0 %v8480_v18  ;;  %6955 = vmatprep.subr.bf16.mxu1 %v8480_v18  ;;  %10063 = vst [vmem:[#allocation23_spill] sm:$0xff] %v8521_v9  ;;  %v7519_v22 = vunpack.i.h.bf16 %v10059_v30  ;;  %v7524_v25 = vunpack.i.h.bf16 %v10065_v54  ;;  %v2886_v43 = vsel %vm117_vm3, %v7516_v32, 0  ;;  %v10068_v30 = vand.u32 4294901760, %v8454_v8 }
 0x172   :  { %6210 = vmatmul.mubr.f32.gmra.mrb[2].mxu0 %v7852_v11  ;;  %6402 = vmatmul.mubr.f32.gmra.mrb[2].mxu1 %v7854_v13  ;;  %v7521_v11 = vunpack.i.l.bf16 %v10065_v54  ;;  %v10066_v13 = vand.u32 4294901760, %v8461_v42  ;;  %v8556_v54 = vand.u32 4294901760, %v2883_v10  ;;  %v7526_v32 = vunpack.i.l.bf16 %v10070_v55 }
 0x173   :  { %6212 = vmatprep.mubr.f32.mxu0 %v7876_v35  ;;  %6404 = vmatprep.mubr.f32.mxu1 %v7878_v41  ;;  %v8543_v35 = vand.u32 4294901760, %v2880_v5  ;;  %v8545_v41 = vand.u32 4294901760, %v4287_v17  ;;  %v8553_v4 = vsub.f32 %v8454_v8, %v10068_v30  ;;  %v9833_v8 = vand.u32 4294901760, %v8524_v59 }
 0x174   :  { %v8535_v44 = vsub.f32 %v8461_v42, %v10066_v13  ;;  %6909 = vmatpush3.bf16.msra.mxu0 %v8480_v18  ;;  %6957 = vmatpush3.bf16.msra.mxu1 %v8480_v18  ;;  %v8558_v13 = vand.u32 4294901760, %v4290_v26  ;;  %v8560_v18 = vld [vmem:[#allocation2 + $0x60] sm:$0xff]  ;;  %v8573_v42 = vand.u32 4294901760, %v2886_v43 }
 0x175   :  { %6911 = vmatprep.subr.bf16.mxu0 %v8511_v57  ;;  %6959 = vmatprep.subr.bf16.mxu1 %v8511_v57  ;;  %v8579_v14 = vsub.f32 %v2880_v5, %v8543_v35  ;;  %v8582_v30 = vsub.f32 %v4287_v17, %v8545_v41  ;;  %v8597_v17 = vld [vmem:[#allocation2 + $0x70] sm:$0xff] }
 0x176   :  { %10069 = vst [vmem:[#allocation30_spill] sm:$0xff] %v8558_v13  ;;  %6213 = vmatmul.mubr.f32.gmra.mrb[4].mxu0 %v7890_v52  ;;  %6405 = vmatmul.mubr.f32.gmra.mrb[4].mxu1 %v7892_v53  ;;  %v4293_v52 = vsel %vm117_vm3, %v7519_v22, 0  ;;  %v2889_v53 = vsel %vm117_vm3, %v7521_v11, 0  ;;  %v8592_v11 = vsub.f32 %v2883_v10, %v8556_v54  ;;  %v8595_v5 = vsub.f32 %v4290_v26, %v8558_v13 }
 0x177   :  { %6215 = vmatprep.mubr.f32.mxu0 %v7912_v19  ;;  %6407 = vmatprep.mubr.f32.mxu1 %v7914_v16  ;;  %10071 = vst [vmem:[#allocation31_spill] sm:$0xff] %v8579_v14  ;;  %10072 = vst [vmem:[#allocation42_spill] sm:$0xff] %v8582_v30  ;;  %v4296_v19 = vsel %vm117_vm3, %v7524_v25, 0  ;;  %v10075_v25 = vand.u32 4294901760, %v8521_v9  ;;  %v10076_v16 = vand.u32 4294901760, %v8514_v21  ;;  %v8611_v10 = vand.u32 4294901760, %v4293_v52 }
 0x178   :  { %1436 = vrot.lane.b32.xlu1 %v8560_v18, %s7609_s25  ;;  %1442 = vrot.lane.b32.xlu0 %v8562_v24, %s7609_s25  ;;  %10073 = vst [vmem:[#allocation34_spill] sm:$0xff] %v8592_v11  ;;  %10074 = vst [vmem:[#allocation35_spill] sm:$0xff] %v8595_v5  ;;  %v8613_v26 = vand.u32 4294901760, %v2889_v53  ;;  %v2892_v13 = vsel %vm117_vm3, %v7526_v32, 0 }
 0x179   :  { %v8604_v63 = vsub.f32 %v8521_v9, %v10075_v25  ;;  %v8609_v22 = vsub.f32 %v8514_v21, %v10076_v16  ;;  %v8628_v16 = vsub.f32 %v2886_v43, %v8573_v42  ;;  %v8630_v21 = vand.u32 4294901760, %v4296_v19 }
 0x17a   :  { %6216 = vmatmul.mubr.f32.gmra.mrb[6].mxu0 %v7940_v45  ;;  %6408 = vmatmul.mubr.f32.gmra.mrb[6].mxu1 %v7942_v27  ;;  %v8620_v45 = vsub.f32 %v8524_v59, %v9833_v8  ;;  %v10077_v27 = vand.u32 4294901760, %v8538_v61  ;;  %v7529_v9 = vunpack.i.h.bf16 %v10070_v55  ;;  %v10079_v43 = vand.u32 4294901760, %v8416_v6 }
 0x17b   :  { %6218 = vmatprep.mubr.f32.mxu0 %v7952_v7  ;;  %6410 = vmatprep.mubr.f32.mxu1 %v7954_v60  ;;  %10078 = vst [vmem:[#allocation37_spill] sm:$0xff] %v8628_v16  ;;  %v10080_v55 = vand.u32 4294901760, %v8421_v1  ;;  %v8658_v60 = vsub.f32 %v2889_v53, %v8613_v26  ;;  %v10088_v8 = vand.u32 4294901760, %v8595_v5  ;;  %v10104_v59 = vand.u32 4294901760, %v8501_v20 }
 0x17c   :  { %v8625_v25 = vsub.f32 %v8538_v61, %v10077_v27  ;;  %1440 = vrot.lane.b32.xlu1 %v8597_v17, %s7609_s25  ;;  %v8643_v61 = vsub.f32 %v8416_v6, %v10079_v43  ;;  %v8655_v27 = vsub.f32 %v4293_v52, %v8611_v10  ;;  %v10085_v52 = vand.u32 4294901760, %v8579_v14  ;;  %2821 = vrot.lane.b32.xlu0 %v8314_v34, %s7610_s1 }
 0x17d   :  { %v8648_v7 = vsub.f32 %v8421_v1, %v10080_v55  ;;  %10082 = vst [vmem:[#allocation43_spill] sm:$0xff] %v8658_v60  ;;  %v8667_v1 = vand.u32 4294901760, %v2892_v13  ;;  %v4299_v55 = vsel %vm117_vm3, %v7529_v9, 0  ;;  %v10087_v6 = vand.u32 4294901760, %v8592_v11 }
 0x17e   :  { %6219 = vmatmul.mubr.f32.gmra.mrb[8].mxu0 %v10019_v38  ;;  %6411 = vmatmul.mubr.f32.gmra.mrb[8].mxu1 %v10020_v47  ;;  %10081 = vst [vmem:[#allocation36_spill] sm:$0xff] %v8655_v27  ;;  %v8665_v47 = vsub.f32 %v4296_v19, %v8630_v21  ;;  %v8673_v53 = vsub.f32 %v8579_v14, %v10085_v52  ;;  %v10089_v38 = vld [vmem:[#allocation49_spill] sm:$0xff]  ;;  %v10094_v52 = vand.u32 4294901760, %v8643_v61 }
 0x17f   :  { %6221 = vmatprep.mubr.f32.mxu0 %v10021_v50  ;;  %6413 = vmatprep.mubr.f32.mxu1 %v10022_v23  ;;  %10084 = vst [vmem:[#allocation39_spill] sm:$0xff] %v8667_v1  ;;  %v10086_v50 = vand.u32 4294901760, %v8582_v30  ;;  %v8684_v19 = vsub.f32 %v8592_v11, %v10087_v6  ;;  %v8689_v43 = vsub.f32 %v8595_v5, %v10088_v8  ;;  %v7534_v14 = vunpack.i.h.bf16 %v10089_v38 }
 0x180   :  { %10083 = vst [vmem:[#allocation40_spill] sm:$0xff] %v8665_v47  ;;  %v10090_v8 = vand.u32 4294901760, %v8628_v16  ;;  %2819 = vrot.lane.b32.xlu1 %v8340_v28, %s7610_s1  ;;  %2825 = vrot.lane.b32.xlu0 %v8350_v36, %s7610_s1 }
 0x181   :  { %v8678_v23 = vsub.f32 %v8582_v30, %v10086_v50  ;;  %v7531_v50 = vunpack.i.l.bf16 %v10089_v38  ;;  %v8708_v38 = vsub.f32 %v2892_v13, %v8667_v1  ;;  %v10097_v13 = vand.u32 4294901760, %v8658_v60 }
 0x182   :  { %6222 = vmatmul.mubr.f32.gmra.mrb[10].mxu0 %v10027_v15  ;;  %6414 = vmatmul.mubr.f32.gmra.mrb[10].mxu1 %v10028_v2  ;;  %v8704_v32 = vsub.f32 %v8628_v16, %v10090_v8  ;;  %v8710_v15 = vand.u32 4294901760, %v4299_v55  ;;  %v10093_v2 = vld [vmem:[#allocation50_spill] sm:$0xff]  ;;  %v3162_v16 = vsub.f32 %v8643_v61, %v10094_v52  ;;  %v4302_v11 = vsel %vm117_vm3, %v7534_v14, 0 }
 0x183   :  { %6224 = vmatprep.mubr.f32.mxu0 %v10029_v33  ;;  %6416 = vmatprep.mubr.f32.mxu1 %v10030_v29  ;;  %10091 = vst [vmem:[#allocation44_spill] sm:$0xff] %v8708_v38  ;;  %v7539_v9 = vunpack.i.h.bf16 %v10093_v2  ;;  %v7536_v6 = vunpack.i.l.bf16 %v10093_v2  ;;  %v10095_v2 = vand.u32 4294901760, %v8648_v7  ;;  %v10096_v29 = vand.u32 4294901760, %v8655_v27 }
 0x184   :  { %10092 = vst [vmem:[#allocation45_spill] sm:$0xff] %v8710_v15  ;;  %v8738_v8 = vsub.f32 %v8658_v60, %v10097_v13  ;;  %v2895_v52 = vsel %vm117_vm3, %v7531_v50, 0  ;;  %v8752_v13 = vsub.f32 %v4299_v55, %v8710_v15  ;;  %v10100_v60 = vld [vmem:[#allocation51_spill] sm:$0xff]  ;;  %2823 = vrot.lane.b32.xlu1 %v8338_v31, %s7610_s1  ;;  %v3163_v55 = vand.u32 4294901760, %v3162_v16  ;;  %2829 = vrot.lane.b32.xlu0 %v8352_v12, %s7610_s1 }
 0x185   :  { %v3169_v33 = vsub.f32 %v8648_v7, %v10095_v2  ;;  %v8733_v5 = vsub.f32 %v8655_v27, %v10096_v29  ;;  %v7544_v50 = vunpack.i.h.bf16 %v10100_v60  ;;  %v7541_v14 = vunpack.i.l.bf16 %v10100_v60 }
 0x186   :  { %6225 = vmatmul.mubr.f32.gmra.mrb[12].mxu0 %v10037_v51  ;;  %6417 = vmatmul.mubr.f32.gmra.mrb[12].mxu1 %v10038_v49  ;;  %v10098_v49 = vand.u32 4294901760, %v8665_v47  ;;  %10099 = vst [vmem:[#allocation46_spill] sm:$0xff] %v8752_v13  ;;  %v8770_v27 = vand.u32 4294901760, %v4302_v11  ;;  %v10103_v30 = vand.u32 4294901760, %v8535_v44 }
 0x187   :  { %6227 = vmatprep.mubr.f32.mxu0 %v10039_v39  ;;  %6419 = vmatprep.mubr.f32.mxu1 %v10040_v46  ;;  %v2898_v39 = vsel %vm117_vm3, %v7536_v6, 0  ;;  %v4305_v46 = vsel %vm117_vm3, %v7539_v9, 0  ;;  %v8768_v6 = vand.u32 4294901760, %v2895_v52  ;;  %v10108_v9 = vld [vmem:[#allocation8_spill] sm:$0xff]  ;;  %v2901_v44 = vsel %vm117_vm3, %v7541_v14, 0 }
 0x188   :  { %v8748_v29 = vsub.f32 %v8665_v47, %v10098_v49  ;;  %v10101_v49 = vld [vmem:[#allocation7_spill] sm:$0xff]  ;;  %v3170_v47 = vand.u32 4294901760, %v3169_v33  ;;  %10102 = vst [vmem:[#allocation47_spill] sm:$0xff] %v8770_v27  ;;  %v8782_v33 = vand.u32 4294901760, %v2898_v39  ;;  %v7551_v60 = vunpack.i.l.bf16 %v10108_v9  ;;  %2827 = vrot.lane.b32.xlu1 %v8364_v0, %s7610_s1 }
 0x189   :  { %v7549_v51 = vunpack.i.h.bf16 %v10101_v49  ;;  %v7546_v2 = vunpack.i.l.bf16 %v10101_v49  ;;  %v8784_v49 = vand.u32 4294901760, %v4305_v46  ;;  %v4308_v20 = vsel %vm117_vm3, %v7544_v50, 0  ;;  %v10111_v50 = vld [vmem:[#allocation9_spill] sm:$0xff] }
 0x18a   :  { %6228 = vmatmul.mubr.f32.gmra.mrb[14].mxu0 %v10050_v48  ;;  %6420 = vmatmul.mubr.f32.gmra.mrb[14].mxu1 %v10051_v62  ;;  %v10105_v48 = vand.u32 4294901760, %v8708_v38  ;;  %10106 = vst [vmem:[#allocation48_spill] sm:$0xff] %v8782_v33  ;;  %v10110_v14 = vand.u32 4294901760, %v8507_v56  ;;  %v7559_v15 = vunpack.i.h.bf16 %v10111_v50  ;;  %v7556_v12 = vunpack.i.l.bf16 %v10111_v50 }
 0x18b   :  { %6430 = vmatprep.mubr.f32.mxu0 %v10103_v30  ;;  %6622 = vmatprep.mubr.f32.mxu1 %v10104_v59  ;;  %10107 = vst [vmem:[#allocation49_spill] sm:$0xff] %v8784_v49  ;;  %v7554_v59 = vunpack.i.h.bf16 %v10108_v9  ;;  %v6914_v30 = vpack.c.bf16 %v3170_v47, %v3163_v55  ;;  %v4311_v16 = vsel %vm117_vm3, %v7549_v51, 0  ;;  %v8804_v1 = vsub.f32 %v2895_v52, %v8768_v6  ;;  %v10123_v55 = vld [vmem:[#allocation10_spill] sm:$0xff] }
 0x18c   :  { %v8780_v62 = vsub.f32 %v8708_v38, %v10105_v48  ;;  %v2904_v48 = vsel %vm117_vm3, %v7546_v2, 0  ;;  %v10109_v38 = vand.u32 4294901760, %v8553_v4  ;;  %v8807_v9 = vsub.f32 %v4302_v11, %v8770_v27 }
 0x18d   :  { %10112 = vst [vmem:[#allocation50_spill] sm:$0xff] %v8804_v1  ;;  %v10114_v47 = vand.u32 4294901760, %v8604_v63  ;;  %v8813_v4 = vsub.f32 %v2898_v39, %v8782_v33  ;;  %v8816_v56 = vsub.f32 %v4305_v46, %v8784_v49  ;;  %v8820_v51 = vand.u32 4294901760, %v4308_v20 }
 0x18e   :  { %6431 = vmatmul.mubr.f32.vlgmr.msra.gmra.mrb[16].mxu0 %v10109_v38  ;;  %6623 = vmatmul.mubr.f32.vlgmr.msra.gmra.mrb[16].mxu1 %v10110_v14  ;;  %10113 = vst [vmem:[#allocation51_spill] sm:$0xff] %v8807_v9  ;;  %v8818_v38 = vand.u32 4294901760, %v2901_v44  ;;  %v10119_v52 = vand.u32 4294901760, %v8609_v22  ;;  %v10120_v11 = vand.u32 4294901760, %v8752_v13  ;;  %v8828_v2 = vand.u32 4294901760, %v2904_v48 }
 0x18f   :  { %6913 = vmatpush3.bf16.msra.mxu0 %v8511_v57  ;;  %6433 = vmatprep.mubr.f32.mxu0 %v10114_v47  ;;  %10115 = vst [vmem:[#allocation7_spill] sm:$0xff] %v8813_v4  ;;  %10116 = vst [vmem:[#allocation8_spill] sm:$0xff] %v8816_v56  ;;  %v8830_v39 = vand.u32 4294901760, %v4311_v16  ;;  %v2907_v46 = vsel %vm117_vm3, %v7551_v60, 0  ;;  %v7564_v14 = vunpack.i.h.bf16 %v10123_v55  ;;  %v7561_v50 = vunpack.i.l.bf16 %v10123_v55 }
 0x190   :  { %10117 = vst [vmem:[#allocation9_spill] sm:$0xff] %v8818_v38  ;;  %10118 = vst [vmem:[#allocation52_spill] sm:$0xff] %v8820_v51  ;;  %6625 = vmatprep.mubr.f32.mxu1 %v10119_v52  ;;  %6961 = vmatpush3.bf16.msra.mxu1 %v8511_v57  ;;  %v4474_v63 = vsub.f32 %v8752_v13, %v10120_v11  ;;  %v4314_v22 = vsel %vm117_vm3, %v7554_v59, 0  ;;  %v10124_v57 = vld [vmem:[#allocation15_spill] sm:$0xff]  ;;  %v10125_v52 = vand.u32 4294901760, %v8620_v45  ;;  %v10126_v11 = vand.u32 4294901760, %v8625_v25 }
 0x191   :  { %10121 = vst [vmem:[#allocation53_spill] sm:$0xff] %v8828_v2  ;;  %10122 = vst [vmem:[#allocation54_spill] sm:$0xff] %v8830_v39  ;;  %6915 = vmatprep.subr.bf16.mxu0 %v6914_v30  ;;  %6963 = vmatprep.subr.bf16.mxu1 %v6914_v30  ;;  %v8838_v47 = vpack.c.bf16 %v10124_v57, %v8380_v3  ;;  %v9865_v60 = vand.u32 4294901760, %v8804_v1  ;;  %v9866_v13 = vand.u32 4294901760, %v8807_v9  ;;  %v2910_v55 = vsel %vm117_vm3, %v7556_v12, 0 }
 0x192   :  { %6434 = vmatmul.mubr.f32.gmra.mrb[18].mxu0 %v10125_v52  ;;  %6626 = vmatmul.mubr.f32.gmra.mrb[18].mxu1 %v10126_v11  ;;  %v4317_v49 = vsel %vm117_vm3, %v7559_v15, 0  ;;  %v10127_v59 = vand.u32 4294901760, %v8673_v53  ;;  %v10128_v57 = vand.u32 4294901760, %v8678_v23  ;;  %v8855_v25 = vsub.f32 %v2901_v44, %v8818_v38 }
 0x193   :  { %v8858_v11 = vsub.f32 %v4308_v20, %v8820_v51  ;;  %6917 = vmatpush3.bf16.msra.mxu0 %v6914_v30  ;;  %v8861_v12 = vsub.f32 %v2904_v48, %v8828_v2  ;;  %v8864_v53 = vsub.f32 %v4311_v16, %v8830_v39  ;;  %v8866_v23 = vand.u32 4294901760, %v2907_v46 }
 0x194   :  { %6436 = vmatprep.mubr.f32.mxu0 %v10127_v59  ;;  %6628 = vmatprep.mubr.f32.mxu1 %v10128_v57  ;;  %v8868_v15 = vand.u32 4294901760, %v4314_v22  ;;  %v8870_v57 = vand.u32 4294901760, %v2910_v55  ;;  %v8872_v59 = vand.u32 4294901760, %v4317_v49  ;;  %v2913_v44 = vsel %vm117_vm3, %v7561_v50, 0 }
 0x195   :  { %6965 = vmatpush3.bf16.msra.mxu1 %v6914_v30  ;;  %10129 = vst [vmem:[#allocation10_spill] sm:$0xff] %v8861_v12  ;;  %10130 = vst [vmem:[#allocation55_spill] sm:$0xff] %v8866_v23  ;;  %v4320_v20 = vsel %vm117_vm3, %v7564_v14, 0  ;;  %6919 = vmatprep.subr.bf16.mxu0 %v8838_v47  ;;  %v10134_v30 = vand.u32 4294901760, %v8684_v19  ;;  %v10135_v16 = vand.u32 4294901760, %v8689_v43  ;;  %v3068_v48 = vand.u32 4294901760, %v8780_v62 }
 0x196   :  { %10131 = vst [vmem:[#allocation56_spill] sm:$0xff] %v8868_v15  ;;  %10132 = vst [vmem:[#allocation57_spill] sm:$0xff] %v8870_v57  ;;  %6967 = vmatprep.subr.bf16.mxu1 %v8838_v47  ;;  %v4475_v52 = vand.u32 4294901760, %v4474_v63  ;;  %v3077_v45 = vsub.f32 %v8804_v1, %v9865_v60  ;;  %v4484_v14 = vsub.f32 %v8807_v9, %v9866_v13  ;;  %v10136_v50 = vand.u32 4294901760, %v8704_v32 }
 0x197   :  { %10133 = vst [vmem:[#allocation58_spill] sm:$0xff] %v8872_v59  ;;  %6437 = vmatmul.mubr.f32.gmra.mrb[20].mxu0 %v10134_v30  ;;  %6629 = vmatmul.mubr.f32.gmra.mrb[20].mxu1 %v10135_v16  ;;  %v10137_v19 = vand.u32 4294901760, %v8733_v5  ;;  %v10138_v43 = vand.u32 4294901760, %v8813_v4  ;;  %v10139_v62 = vand.u32 4294901760, %v8816_v56  ;;  %v8902_v13 = vsub.f32 %v2907_v46, %v8866_v23 }
 0x198   :  { %6439 = vmatprep.mubr.f32.mxu0 %v10136_v50  ;;  %v8905_v32 = vsub.f32 %v4314_v22, %v8868_v15  ;;  %v8907_v5 = vand.u32 4294901760, %v2913_v44  ;;  %v8909_v50 = vand.u32 4294901760, %v4320_v20  ;;  %v8918_v46 = vsub.f32 %v2910_v55, %v8870_v57 }
 0x199   :  { %6631 = vmatprep.mubr.f32.mxu1 %v10137_v19  ;;  %v3087_v30 = vsub.f32 %v8813_v4, %v10138_v43  ;;  %v4494_v63 = vsub.f32 %v8816_v56, %v10139_v62  ;;  %v10143_v19 = vld [vmem:[#allocation13_spill] sm:$0xff]  ;;  %v10144_v43 = vld [vmem:[#allocation16_spill] sm:$0xff]  ;;  %v8921_v22 = vsub.f32 %v4317_v49, %v8872_v59  ;;  %v10145_v16 = vand.u32 4294901760, %v8738_v8 }
 0x19a   :  { %10140 = vst [vmem:[#allocation59_spill] sm:$0xff] %v8905_v32  ;;  %10141 = vst [vmem:[#allocation60_spill] sm:$0xff] %v8907_v5  ;;  %2833 = vrot.lane.b32.xlu0 %v10143_v19, %s7610_s1  ;;  %2831 = vrot.lane.b32.xlu1 %v10144_v43, %s7610_s1  ;;  %v10146_v56 = vand.u32 4294901760, %v8748_v29  ;;  %v3078_v4 = vand.u32 4294901760, %v3077_v45  ;;  %v4485_v9 = vand.u32 4294901760, %v4484_v14  ;;  %v10147_v60 = vand.u32 4294901760, %v8855_v25 }
 0x19b   :  { %10142 = vst [vmem:[#allocation61_spill] sm:$0xff] %v8909_v50  ;;  %6440 = vmatmul.mubr.f32.gmra.mrb[22].mxu0 %v10145_v16  ;;  %v3088_v1 = vand.u32 4294901760, %v3087_v30  ;;  %v4495_v62 = vand.u32 4294901760, %v4494_v63  ;;  %v10148_v3 = vand.u32 4294901760, %v8858_v11  ;;  %v9878_v8 = vand.u32 4294901760, %v8902_v13  ;;  %v10149_v45 = vld [vmem:[#allocation17_spill] sm:$0xff] }
 0x19c   :  { %6632 = vmatmul.mubr.f32.gmra.mrb[22].mxu1 %v10146_v56  ;;  %6442 = vmatprep.mubr.f32.mxu0 %v3068_v48  ;;  %v3097_v55 = vsub.f32 %v8855_v25, %v10147_v60  ;;  %v8936_v29 = vsub.f32 %v2913_v44, %v8907_v5  ;;  %v8939_v56 = vsub.f32 %v4320_v20, %v8909_v50  ;;  %v10151_v60 = vand.u32 4294901760, %v8861_v12  ;;  %v10154_v30 = vld [vmem:[#allocation27_spill] sm:$0xff] }
 0x19d   :  { %6634 = vmatprep.mubr.f32.mxu1 %v4475_v52  ;;  %v4504_v49 = vsub.f32 %v8858_v11, %v10148_v3  ;;  %v10150_v52 = vld [vmem:[#allocation26_spill] sm:$0xff]  ;;  %v10152_v48 = vand.u32 4294901760, %v8864_v53  ;;  %v3117_v16 = vsub.f32 %v8902_v13, %v9878_v8 }
 0x19e   :  { %2837 = vrot.lane.b32.xlu0 %v10149_v45, %s7610_s1  ;;  %2835 = vrot.lane.b32.xlu1 %v10150_v52, %s7610_s1  ;;  %v3107_v3 = vsub.f32 %v8861_v12, %v10151_v60  ;;  %v3098_v20 = vand.u32 4294901760, %v3097_v55  ;;  %v10153_v60 = vand.u32 4294901760, %v8905_v32 }
 0x19f   :  { %v4514_v14 = vsub.f32 %v8864_v53, %v10152_v48  ;;  %6443 = vmatmul.mubr.f32.gmra.mrb[24].mxu0 %v3078_v4  ;;  %v4505_v63 = vand.u32 4294901760, %v4504_v49  ;;  %v9881_v48 = vand.u32 4294901760, %v8936_v29  ;;  %v10157_v49 = vand.u32 4294901760, %v8921_v22 }
 0x1a0   :  { %6635 = vmatmul.mubr.f32.gmra.mrb[24].mxu1 %v4485_v9  ;;  %6445 = vmatprep.mubr.f32.mxu0 %v3088_v1  ;;  %v4524_v12 = vsub.f32 %v8905_v32, %v10153_v60  ;;  %v10155_v1 = vld [vmem:[#allocation38_spill] sm:$0xff]  ;;  %v3108_v9 = vand.u32 4294901760, %v3107_v3  ;;  %v3118_v8 = vand.u32 4294901760, %v3117_v16  ;;  %v10158_v3 = vand.u32 4294901760, %v8939_v56 }
 0x1a1   :  { %6637 = vmatprep.mubr.f32.mxu1 %v4495_v62  ;;  %v4515_v4 = vand.u32 4294901760, %v4514_v14  ;;  %v10156_v62 = vand.u32 4294901760, %v8918_v46  ;;  %v4534_v60 = vsub.f32 %v8921_v22, %v10157_v49  ;;  %v3137_v32 = vsub.f32 %v8936_v29, %v9881_v48  ;;  %v10168_v49 = vld [vmem:[#allocation45_spill] sm:$0xff]  ;;  %v10192_v48 = vld [vmem:[#allocation44_spill] sm:$0xff] }
 0x1a2   :  { %2841 = vrot.lane.b32.xlu0 %v10154_v30, %s7610_s1  ;;  %2839 = vrot.lane.b32.xlu1 %v10155_v1, %s7610_s1  ;;  %v4525_v44 = vand.u32 4294901760, %v4524_v12  ;;  %v4544_v14 = vsub.f32 %v8939_v56, %v10158_v3 }
 0x1a3   :  { %v3127_v55 = vsub.f32 %v8918_v46, %v10156_v62  ;;  %6446 = vmatmul.mubr.f32.gmra.mrb[26].mxu0 %v3098_v20  ;;  %v10159_v62 = vld [vmem:[#allocation5_spill] sm:$0xff]  ;;  %v3138_v12 = vand.u32 4294901760, %v3137_v32  ;;  %v6922_v32 = vpack.c.bf16 %v8648_v7, %v8643_v61 }
 0x1a4   :  { %6638 = vmatmul.mubr.f32.gmra.mrb[26].mxu1 %v4505_v63  ;;  %6448 = vmatprep.mubr.f32.mxu0 %v3108_v9  ;;  %v4535_v63 = vand.u32 4294901760, %v4534_v60  ;;  %v4545_v16 = vand.u32 4294901760, %v4544_v14  ;;  %v10160_v9 = vld [vmem:[#allocation29_spill] sm:$0xff]  ;;  %v10169_v60 = vld [vmem:[#allocation12_spill] sm:$0xff]  ;;  %v10180_v14 = vld [vmem:[#allocation15_spill] sm:$0xff] }
 0x1a5   :  { %6640 = vmatprep.mubr.f32.mxu1 %v4515_v4  ;;  %v3128_v20 = vand.u32 4294901760, %v3127_v55  ;;  %v10161_v4 = vld [vmem:[#allocation20_spill] sm:$0xff]  ;;  %v10166_v55 = vld [vmem:[#allocation30_spill] sm:$0xff] }
 0x1a6   :  { %2845 = vrot.lane.b32.xlu0 %v10159_v62, %s7610_s1  ;;  %2843 = vrot.lane.b32.xlu1 %v8560_v18, %s7610_s1 }
 0x1a7   :  { %6449 = vmatmul.mubr.f32.gmra.mrb[28].mxu0 %v3118_v8  ;;  %v10162_v8 = vld [vmem:[#allocation28_spill] sm:$0xff] }
 0x1a8   :  { %6641 = vmatmul.mubr.f32.gmra.mrb[28].mxu1 %v4525_v44  ;;  %6451 = vmatprep.mubr.f32.mxu0 %v3128_v20  ;;  %v10163_v44 = vld [vmem:[#allocation21_spill] sm:$0xff]  ;;  %v10182_v20 = vld [vmem:[#allocation24_spill] sm:$0xff] }
 0x1a9   :  { %6643 = vmatprep.mubr.f32.mxu1 %v4535_v63  ;;  %v10183_v63 = vld [vmem:[#allocation25_spill] sm:$0xff] }
 0x1aa   :  { %2849 = vrot.lane.b32.xlu0 %v8562_v24, %s7610_s1  ;;  %2847 = vrot.lane.b32.xlu1 %v8597_v17, %s7610_s1 }
 0x1ab   :  { %6452 = vmatmul.mubr.f32.gmra.mrb[30].mxu0 %v3138_v12  ;;  %v10184_v12 = vld [vmem:[#allocation31_spill] sm:$0xff] }
 0x1ac   :  { %6644 = vmatmul.mubr.f32.gmra.mrb[30].mxu1 %v4545_v16  ;;  %6462 = vmatprep.mubr.f32.mxu0 %v10160_v9  ;;  %v10185_v16 = vld [vmem:[#allocation42_spill] sm:$0xff] }
 0x1ad   :  { %6654 = vmatprep.mubr.f32.mxu1 %v10161_v4 }
 0x1ae   :  { %4228 = vrot.lane.b32.xlu0 %v8314_v34, %s7611_s30  ;;  %4226 = vrot.lane.b32.xlu1 %v8340_v28, %s7611_s30  ;;  %v10164_v34 = vld [vmem:[#allocation19_spill] sm:$0xff] }
 0x1af   :  { %6463 = vmatmul.mubr.f32.vlgmr.msra.gmra.mrb[16].mxu0 %v10162_v8  ;;  %v10165_v28 = vld [vmem:[#allocation11_spill] sm:$0xff] }
 0x1b0   :  { %6655 = vmatmul.mubr.f32.vlgmr.msra.gmra.mrb[16].mxu1 %v10163_v44  ;;  %6921 = vmatpush3.bf16.msra.mxu0 %v8838_v47 }
 0x1b1   :  { %6465 = vmatprep.mubr.f32.mxu0 %v8486_v40  ;;  %6657 = vmatprep.mubr.f32.mxu1 %v8468_v37 }
 0x1b2   :  { %6969 = vmatpush3.bf16.msra.mxu1 %v8838_v47  ;;  %6923 = vmatprep.subr.bf16.mxu0 %v6922_v32  ;;  %v10167_v47 = vld [vmem:[#allocation39_spill] sm:$0xff] }
 0x1b3   :  { %6971 = vmatprep.subr.bf16.mxu1 %v6922_v32  ;;  %6466 = vmatmul.mubr.f32.gmra.mrb[18].mxu0 %v8488_v58 }
 0x1b4   :  { %6658 = vmatmul.mubr.f32.gmra.mrb[18].mxu1 %v10164_v34  ;;  %6468 = vmatprep.mubr.f32.mxu0 %v8543_v35 }
 0x1b5   :  { %6660 = vmatprep.mubr.f32.mxu1 %v8545_v41  ;;  %6925 = vmatpush3.bf16.msra.mxu0 %v6922_v32 }
 0x1b6   :  { %6973 = vmatpush3.bf16.msra.mxu1 %v6922_v32  ;;  %6927 = vmatprep.subr.bf16.mxu0 %v10165_v28  ;;  %v10186_v32 = vld [vmem:[#allocation34_spill] sm:$0xff] }
 0x1b7   :  { %6975 = vmatprep.subr.bf16.mxu1 %v10165_v28  ;;  %6469 = vmatmul.mubr.f32.gmra.mrb[20].mxu0 %v8556_v54 }
 0x1b8   :  { %6661 = vmatmul.mubr.f32.gmra.mrb[20].mxu1 %v10166_v55  ;;  %6471 = vmatprep.mubr.f32.mxu0 %v8573_v42 }
 0x1b9   :  { %6663 = vmatprep.mubr.f32.mxu1 %v8611_v10  ;;  %4232 = vrot.lane.b32.xlu0 %v8350_v36, %s7611_s30  ;;  %v10171_v36 = vld [vmem:[#allocation41_spill] sm:$0xff] }
 0x1ba   :  { %4230 = vrot.lane.b32.xlu1 %v8338_v31, %s7611_s30  ;;  %v10170_v31 = vld [vmem:[#allocation49_spill] sm:$0xff] }
 0x1bb   :  { %6472 = vmatmul.mubr.f32.gmra.mrb[22].mxu0 %v8613_v26 }
 0x1bc   :  { %6664 = vmatmul.mubr.f32.gmra.mrb[22].mxu1 %v8630_v21  ;;  %6474 = vmatprep.mubr.f32.mxu0 %v10167_v47 }
 0x1bd   :  { %6666 = vmatprep.mubr.f32.mxu1 %v10168_v49  ;;  %4236 = vrot.lane.b32.xlu0 %v10169_v60, %s7611_s30  ;;  %v10187_v60 = vld [vmem:[#allocation35_spill] sm:$0xff] }
 0x1be   :  { %4234 = vrot.lane.b32.xlu1 %v8364_v0, %s7611_s30  ;;  %v10172_v0 = vld [vmem:[#allocation32_spill] sm:$0xff] }
 0x1bf   :  { %6475 = vmatmul.mubr.f32.gmra.mrb[24].mxu0 %v8768_v6 }
 0x1c0   :  { %6667 = vmatmul.mubr.f32.gmra.mrb[24].mxu1 %v8770_v27  ;;  %6477 = vmatprep.mubr.f32.mxu0 %v8782_v33 }
 0x1c1   :  { %6669 = vmatprep.mubr.f32.mxu1 %v10170_v31  ;;  %4240 = vrot.lane.b32.xlu0 %v10143_v19, %s7611_s30  ;;  %v10173_v19 = vld [vmem:[#allocation6_spill] sm:$0xff] }
 0x1c2   :  { %4238 = vrot.lane.b32.xlu1 %v10144_v43, %s7611_s30  ;;  %v10174_v43 = vld [vmem:[#allocation33_spill] sm:$0xff]  ;;  %v10204_v31 = vand.u32 4294901760, %v10173_v19 }
 0x1c3   :  { %6478 = vmatmul.mubr.f32.gmra.mrb[26].mxu0 %v8818_v38  ;;  %v10205_v33 = vand.u32 4294901760, %v10174_v43 }
 0x1c4   :  { %6670 = vmatmul.mubr.f32.gmra.mrb[26].mxu1 %v8820_v51  ;;  %6480 = vmatprep.mubr.f32.mxu0 %v8828_v2  ;;  %v10202_v2 = vand.u32 4294901760, %v8643_v61  ;;  %v10203_v51 = vand.u32 4294901760, %v8648_v7  ;;  %v10208_v61 = vand.u32 4294901760, %v10182_v20  ;;  %v10209_v7 = vand.u32 4294901760, %v10183_v63 }
 0x1c5   :  { %6672 = vmatprep.mubr.f32.mxu1 %v8830_v39  ;;  %4244 = vrot.lane.b32.xlu0 %v10149_v45, %s7611_s30  ;;  %v10175_v45 = vld [vmem:[#allocation23_spill] sm:$0xff]  ;;  %v10201_v39 = vand.u32 4294901760, %v10172_v0 }
 0x1c6   :  { %4242 = vrot.lane.b32.xlu1 %v10150_v52, %s7611_s30  ;;  %v10176_v52 = vld [vmem:[#allocation22_spill] sm:$0xff]  ;;  %v6938_v38 = vpack.c.bf16 %v10203_v51, %v10202_v2  ;;  %v10206_v27 = vand.u32 4294901760, %v10175_v45  ;;  %v10210_v51 = vand.u32 4294901760, %v10184_v12  ;;  %v10213_v2 = vand.u32 4294901760, %v10187_v60 }
 0x1c7   :  { %6481 = vmatmul.mubr.f32.gmra.mrb[28].mxu0 %v8866_v23  ;;  %v10200_v23 = vand.u32 4294901760, %v10171_v36 }
 0x1c8   :  { %6673 = vmatmul.mubr.f32.gmra.mrb[28].mxu1 %v8868_v15  ;;  %6483 = vmatprep.mubr.f32.mxu0 %v8870_v57  ;;  %v10196_v57 = vld [vmem:[#allocation7_spill] sm:$0xff]  ;;  %v10197_v15 = vld [vmem:[#allocation8_spill] sm:$0xff] }
 0x1c9   :  { %6675 = vmatprep.mubr.f32.mxu1 %v8872_v59  ;;  %4248 = vrot.lane.b32.xlu0 %v10154_v30, %s7611_s30  ;;  %v10177_v30 = vld [vmem:[#allocation18_spill] sm:$0xff]  ;;  %v10195_v59 = vld [vmem:[#allocation51_spill] sm:$0xff] }
 0x1ca   :  { %4246 = vrot.lane.b32.xlu1 %v10155_v1, %s7611_s30  ;;  %v10178_v1 = vld [vmem:[#allocation14_spill] sm:$0xff] }
 0x1cb   :  { %6484 = vmatmul.mubr.f32.gmra.mrb[30].mxu0 %v8907_v5  ;;  %v10179_v3 = vand.u32 4294901760, %v10178_v1  ;;  %v10188_v1 = vld [vmem:[#allocation37_spill] sm:$0xff]  ;;  %v10194_v5 = vld [vmem:[#allocation50_spill] sm:$0xff] }
 0x1cc   :  { %6676 = vmatmul.mubr.f32.gmra.mrb[30].mxu1 %v8909_v50  ;;  %6494 = vmatprep.mubr.f32.mxu0 %v10171_v36  ;;  %v10193_v50 = vld [vmem:[#allocation46_spill] sm:$0xff] }
 0x1cd   :  { %6686 = vmatprep.mubr.f32.mxu1 %v10172_v0  ;;  %4252 = vrot.lane.b32.xlu0 %v10159_v62, %s7611_s30  ;;  %v10218_v0 = vand.u32 4294901760, %v10192_v48 }
 0x1ce   :  { %4250 = vrot.lane.b32.xlu1 %v8560_v18, %s7611_s30  ;;  %v10181_v18 = vand.u32 4294901760, %v10180_v14  ;;  %v10190_v14 = vld [vmem:[#allocation43_spill] sm:$0xff] }
 0x1cf   :  { %6495 = vmatmul.mubr.f32.vlgmr.msra.gmra.mrb[16].mxu0 %v10173_v19  ;;  %v10216_v36 = vand.u32 4294901760, %v10190_v14  ;;  %v10219_v19 = vand.u32 4294901760, %v10193_v50 }
 0x1d0   :  { %6687 = vmatmul.mubr.f32.vlgmr.msra.gmra.mrb[16].mxu1 %v10174_v43  ;;  %6929 = vmatpush3.bf16.msra.mxu0 %v10165_v28  ;;  %v6934_v62 = vpack.c.bf16 %v10181_v18, %v10179_v3  ;;  %v10189_v3 = vld [vmem:[#allocation36_spill] sm:$0xff]  ;;  %v10220_v43 = vand.u32 4294901760, %v10194_v5 }
 0x1d1   :  { %6497 = vmatprep.mubr.f32.mxu0 %v10175_v45  ;;  %6689 = vmatprep.mubr.f32.mxu1 %v10176_v52  ;;  %v10191_v18 = vld [vmem:[#allocation40_spill] sm:$0xff]  ;;  %v10221_v45 = vand.u32 4294901760, %v10195_v59 }
 0x1d2   :  { %6977 = vmatpush3.bf16.msra.mxu1 %v10165_v28  ;;  %6931 = vmatprep.subr.bf16.mxu0 %v10177_v30 }
 0x1d3   :  { %6979 = vmatprep.subr.bf16.mxu1 %v10177_v30  ;;  %6498 = vmatmul.mubr.f32.gmra.mrb[18].mxu0 %v10182_v20  ;;  %v10224_v20 = vand.u32 4294901760, %v8855_v25 }
 0x1d4   :  { %6690 = vmatmul.mubr.f32.gmra.mrb[18].mxu1 %v10183_v63  ;;  %6500 = vmatprep.mubr.f32.mxu0 %v10184_v12  ;;  %v10233_v63 = vand.u32 4294901760, %v8939_v56  ;;  %v10240_v12 = vld [vmem:[#allocation54_spill] sm:$0xff] }
 0x1d5   :  { %6692 = vmatprep.mubr.f32.mxu1 %v10185_v16  ;;  %6933 = vmatpush3.bf16.msra.mxu0 %v10177_v30 }
 0x1d6   :  { %6981 = vmatpush3.bf16.msra.mxu1 %v10177_v30  ;;  %6935 = vmatprep.subr.bf16.mxu0 %v6934_v62 }
 0x1d7   :  { %6983 = vmatprep.subr.bf16.mxu1 %v6934_v62  ;;  %6501 = vmatmul.mubr.f32.gmra.mrb[20].mxu0 %v10186_v32 }
 0x1d8   :  { %6693 = vmatmul.mubr.f32.gmra.mrb[20].mxu1 %v10187_v60  ;;  %6503 = vmatprep.mubr.f32.mxu0 %v10188_v1  ;;  %v10243_v60 = vld [vmem:[#allocation57_spill] sm:$0xff] }
 0x1d9   :  { %6695 = vmatprep.mubr.f32.mxu1 %v10189_v3  ;;  %4256 = vrot.lane.b32.xlu0 %v8562_v24, %s7611_s30  ;;  %v10198_v24 = vld [vmem:[#allocation10_spill] sm:$0xff] }
 0x1da   :  { %4254 = vrot.lane.b32.xlu1 %v8597_v17, %s7611_s30  ;;  %v10199_v17 = vld [vmem:[#allocation59_spill] sm:$0xff] }
 0x1db   :  { %6504 = vmatmul.mubr.f32.gmra.mrb[22].mxu0 %v10190_v14  ;;  %v10245_v14 = vld [vmem:[#allocation60_spill] sm:$0xff] }
 0x1dc   :  { %6696 = vmatmul.mubr.f32.gmra.mrb[22].mxu1 %v10191_v18  ;;  %6506 = vmatprep.mubr.f32.mxu0 %v10192_v48  ;;  %v10225_v48 = vand.u32 4294901760, %v8858_v11 }
 0x1dd   :  { %6698 = vmatprep.mubr.f32.mxu1 %v10193_v50  ;;  %v10226_v50 = vand.u32 4294901760, %v10198_v24 }
 0x1df   :  { %6507 = vmatmul.mubr.f32.gmra.mrb[24].mxu0 %v10194_v5  ;;  %v10227_v5 = vand.u32 4294901760, %v8864_v53 }
 0x1e0   :  { %6699 = vmatmul.mubr.f32.gmra.mrb[24].mxu1 %v10195_v59  ;;  %6509 = vmatprep.mubr.f32.mxu0 %v10196_v57  ;;  %v10228_v59 = vand.u32 4294901760, %v8902_v13 }
 0x1e1   :  { %6701 = vmatprep.mubr.f32.mxu1 %v10197_v15 }
 0x1e3   :  { %6510 = vmatmul.mubr.f32.gmra.mrb[26].mxu0 %v8855_v25  ;;  %v10231_v25 = vand.u32 4294901760, %v8921_v22 }
 0x1e4   :  { %6702 = vmatmul.mubr.f32.gmra.mrb[26].mxu1 %v8858_v11  ;;  %6512 = vmatprep.mubr.f32.mxu0 %v10198_v24  ;;  %v10232_v11 = vand.u32 4294901760, %v8936_v29  ;;  %v1413_v24 = vpop.permute.xlu0 %1412 }
 0x1e5   :  { %6704 = vmatprep.mubr.f32.mxu1 %v8864_v53  ;;  %v10234_v53 = vld [vmem:[#allocation47_spill] sm:$0xff] }
 0x1e7   :  { %6513 = vmatmul.mubr.f32.gmra.mrb[28].mxu0 %v8902_v13  ;;  %v1415_v13 = vpop.permute.xlu1 %1414 }
 0x1e8   :  { %6705 = vmatmul.mubr.f32.gmra.mrb[28].mxu1 %v10199_v17  ;;  %6515 = vmatprep.mubr.f32.mxu0 %v8918_v46 }
 0x1e9   :  { %6707 = vmatprep.mubr.f32.mxu1 %v8921_v22  ;;  %v10236_v22 = vld [vmem:[#allocation49_spill] sm:$0xff] }
 0x1eb   :  { %6516 = vmatmul.mubr.f32.gmra.mrb[30].mxu0 %v8936_v29  ;;  %v10237_v29 = vld [vmem:[#allocation9_spill] sm:$0xff] }
 0x1ec   :  { %6708 = vmatmul.mubr.f32.gmra.mrb[30].mxu1 %v8939_v56  ;;  %6526 = vmatprep.mubr.f32.mxu0 %v10200_v23  ;;  %v10207_v23 = vand.u32 4294901760, %v10176_v52  ;;  %v10222_v52 = vand.u32 4294901760, %v10196_v57  ;;  %v10229_v57 = vand.u32 4294901760, %v10199_v17  ;;  %v10238_v56 = vld [vmem:[#allocation52_spill] sm:$0xff]  ;;  %v9211_v17 = vpop.permute.xlu0 %1422 }
 0x1ed   :  { %6718 = vmatprep.mubr.f32.mxu1 %v10201_v39  ;;  %v10214_v39 = vand.u32 4294901760, %v10188_v1  ;;  %v10244_v1 = vld [vmem:[#allocation58_spill] sm:$0xff] }
 0x1ef   :  { %6527 = vmatmul.mubr.f32.vlgmr.msra.gmra.mrb[16].mxu0 %v10204_v31  ;;  %v10215_v31 = vand.u32 4294901760, %v10189_v3 }
 0x1f0   :  { %6719 = vmatmul.mubr.f32.vlgmr.msra.gmra.mrb[16].mxu1 %v10205_v33  ;;  %6937 = vmatpush3.bf16.msra.mxu0 %v6934_v62  ;;  %v10211_v33 = vand.u32 4294901760, %v10185_v16  ;;  %v10241_v16 = vld [vmem:[#allocation55_spill] sm:$0xff] }
 0x1f1   :  { %6529 = vmatprep.mubr.f32.mxu0 %v10206_v27  ;;  %6721 = vmatprep.mubr.f32.mxu1 %v10207_v23  ;;  %v10212_v27 = vand.u32 4294901760, %v10186_v32  ;;  %v10242_v32 = vld [vmem:[#allocation56_spill] sm:$0xff] }
 0x1f2   :  { %6985 = vmatpush3.bf16.msra.mxu1 %v6934_v62  ;;  %6939 = vmatprep.subr.bf16.mxu0 %v6938_v38  ;;  %v10223_v62 = vand.u32 4294901760, %v10197_v15  ;;  %v10230_v15 = vand.u32 4294901760, %v8918_v46  ;;  %v10235_v46 = vld [vmem:[#allocation48_spill] sm:$0xff] }
 0x1f3   :  { %6987 = vmatprep.subr.bf16.mxu1 %v6938_v38  ;;  %6530 = vmatmul.mubr.f32.gmra.mrb[18].mxu0 %v10208_v61  ;;  %v7567_v61 = vld [vmem:[#allocation2 + $0x18] sm:$0xff] }
 0x1f4   :  { %6722 = vmatmul.mubr.f32.gmra.mrb[18].mxu1 %v10209_v7  ;;  %6532 = vmatprep.mubr.f32.mxu0 %v10210_v51 }
 0x1f5   :  { %6724 = vmatprep.mubr.f32.mxu1 %v10211_v33  ;;  %6941 = vmatpush3.bf16.msra.mxu0 %v6938_v38 }
 0x1f6   :  { %6989 = vmatpush3.bf16.msra.mxu1 %v6938_v38  ;;  %6943 = vmatprep.subr.bf16.mxu0 %v10165_v28  ;;  %v10217_v38 = vand.u32 4294901760, %v10191_v18  ;;  %v10246_v18 = vld [vmem:[#allocation61_spill] sm:$0xff] }
 0x1f7   :  { %6991 = vmatprep.subr.bf16.mxu1 %v10165_v28  ;;  %6533 = vmatmul.mubr.f32.gmra.mrb[20].mxu0 %v10212_v27  ;;  %v7568_v27 = vld [vmem:[#allocation2 + $0x10] sm:$0xff] }
 0x1f8   :  { %6725 = vmatmul.mubr.f32.gmra.mrb[20].mxu1 %v10213_v2  ;;  %6535 = vmatprep.mubr.f32.mxu0 %v10214_v39 }
 0x1f9   :  { %6727 = vmatprep.mubr.f32.mxu1 %v10215_v31 }
 0x1fb   :  { %6536 = vmatmul.mubr.f32.gmra.mrb[22].mxu0 %v10216_v36 }
 0x1fc   :  { %6728 = vmatmul.mubr.f32.gmra.mrb[22].mxu1 %v10217_v38  ;;  %6538 = vmatprep.mubr.f32.mxu0 %v10218_v0 }
 0x1fd   :  { %6730 = vmatprep.mubr.f32.mxu1 %v10219_v19 }
 0x1ff   :  { %6539 = vmatmul.mubr.f32.gmra.mrb[24].mxu0 %v10220_v43  ;;  %v7569_v43 = vld [vmem:[#allocation2 + $0x28] sm:$0xff] }
 0x200   :  { %6731 = vmatmul.mubr.f32.gmra.mrb[24].mxu1 %v10221_v45  ;;  %6541 = vmatprep.mubr.f32.mxu0 %v10222_v52 }
 0x201   :  { %6733 = vmatprep.mubr.f32.mxu1 %v10223_v62 }
 0x203   :  { %6542 = vmatmul.mubr.f32.gmra.mrb[26].mxu0 %v10224_v20  ;;  %v7570_v20 = vld [vmem:[#allocation2 + $0x20] sm:$0xff] }
 0x204   :  { %6734 = vmatmul.mubr.f32.gmra.mrb[26].mxu1 %v10225_v48  ;;  %6544 = vmatprep.mubr.f32.mxu0 %v10226_v50 }
 0x205   :  { %6736 = vmatprep.mubr.f32.mxu1 %v10227_v5 }
 0x207   :  { %6545 = vmatmul.mubr.f32.gmra.mrb[28].mxu0 %v10228_v59 }
 0x208   :  { %6737 = vmatmul.mubr.f32.gmra.mrb[28].mxu1 %v10229_v57  ;;  %6547 = vmatprep.mubr.f32.mxu0 %v10230_v15  ;;  %v7571_v15 = vld [vmem:[#allocation2 + $0x38] sm:$0xff] }
 0x209   :  { %6739 = vmatprep.mubr.f32.mxu1 %v10231_v25 }
 0x20b   :  { %6548 = vmatmul.mubr.f32.gmra.mrb[30].mxu0 %v10232_v11 }
 0x20c   :  { %6740 = vmatmul.mubr.f32.gmra.mrb[30].mxu1 %v10233_v63  ;;  %6558 = vmatprep.mubr.f32.mxu0 %v10160_v9 }
 0x20d   :  { %6750 = vmatprep.mubr.f32.mxu1 %v10161_v4 }
 0x20f   :  { %6559 = vmatmul.mubr.f32.vlgmr.msra.gmra.mrb[16].mxu0 %v10162_v8 }
 0x210   :  { %6751 = vmatmul.mubr.f32.vlgmr.msra.gmra.mrb[16].mxu1 %v10163_v44  ;;  %6945 = vmatpush3.bf16.msra.mxu0 %v10165_v28 }
 0x211   :  { %6561 = vmatprep.mubr.f32.mxu0 %v8486_v40  ;;  %6753 = vmatprep.mubr.f32.mxu1 %v8468_v37 }
 0x212   :  { %6993 = vmatpush3.bf16.msra.mxu1 %v10165_v28  ;;  %6947 = vmatprep.subr.bf16.mxu0 %v10177_v30  ;;  %v9197_v28 = vpop.permute.xlu1 %1416 }
 0x213   :  { %6995 = vmatprep.subr.bf16.mxu1 %v10177_v30  ;;  %6562 = vmatmul.mubr.f32.gmra.mrb[18].mxu0 %v8488_v58 }
 0x214   :  { %6754 = vmatmul.mubr.f32.gmra.mrb[18].mxu1 %v10164_v34  ;;  %6564 = vmatprep.mubr.f32.mxu0 %v8543_v35 }
 0x215   :  { %6756 = vmatprep.mubr.f32.mxu1 %v8545_v41  ;;  %6949 = vmatpush3.bf16.msra.mxu0 %v10177_v30 }
 0x216   :  { %6997 = vmatpush3.bf16.msra.mxu1 %v10177_v30  ;;  %v10239_v30 = vld [vmem:[#allocation53_spill] sm:$0xff]  ;;  %v1419_v3 = vpop.permute.xlu1 %1418 }
 0x217   :  { %6565 = vmatmul.mubr.f32.gmra.mrb[20].mxu0 %v8556_v54 }
 0x218   :  { %6757 = vmatmul.mubr.f32.gmra.mrb[20].mxu1 %v10166_v55  ;;  %6567 = vmatprep.mubr.f32.mxu0 %v8573_v42 }
 0x219   :  { %6759 = vmatprep.mubr.f32.mxu1 %v8611_v10 }
 0x21a   :  { %v9213_v23 = vpop.permute.xlu1 %1420 }
 0x21b   :  { %6568 = vmatmul.mubr.f32.gmra.mrb[22].mxu0 %v8613_v26 }
 0x21c   :  { %6760 = vmatmul.mubr.f32.gmra.mrb[22].mxu1 %v8630_v21  ;;  %6570 = vmatprep.mubr.f32.mxu0 %v10167_v47 }
 0x21d   :  { %6762 = vmatprep.mubr.f32.mxu1 %v10168_v49 }
 0x21f   :  { %6571 = vmatmul.mubr.f32.gmra.mrb[24].mxu0 %v8768_v6 }
 0x220   :  { %6763 = vmatmul.mubr.f32.gmra.mrb[24].mxu1 %v10234_v53  ;;  %6573 = vmatprep.mubr.f32.mxu0 %v10235_v46 }
 0x221   :  { %6765 = vmatprep.mubr.f32.mxu1 %v10236_v22 }
 0x223   :  { %6574 = vmatmul.mubr.f32.gmra.mrb[26].mxu0 %v10237_v29 }
 0x224   :  { %6766 = vmatmul.mubr.f32.gmra.mrb[26].mxu1 %v10238_v56  ;;  %6576 = vmatprep.mubr.f32.mxu0 %v10239_v30 }
 0x225   :  { %6768 = vmatprep.mubr.f32.mxu1 %v10240_v12 }
 0x227   :  { %6577 = vmatmul.mubr.f32.gmra.mrb[28].mxu0 %v10241_v16 }
 0x228   :  { %6769 = vmatmul.mubr.f32.gmra.mrb[28].mxu1 %v10242_v32  ;;  %6579 = vmatprep.mubr.f32.mxu0 %v10243_v60 }
 0x229   :  { %6771 = vmatprep.mubr.f32.mxu1 %v10244_v1 }
 0x22b   :  { %6580 = vmatmul.mubr.f32.gmra.mrb[30].mxu0 %v10245_v14 }
 0x22c   :  { %6772 = vmatmul.mubr.f32.gmra.mrb[30].mxu1 %v10246_v18  ;;  %6590 = vmatprep.mubr.f32.mxu0 %v10160_v9  ;;  %v9221_v9 = vpop.permute.xlu0 %1426 }
 0x22d   :  { %6782 = vmatprep.mubr.f32.mxu1 %v10161_v4  ;;  %v9223_v4 = vpop.permute.xlu1 %1424 }
 0x22f   :  { %6591 = vmatmul.mubr.f32.vlgmr.msra.gmra.mrb[16].mxu0 %v10162_v8 }
 0x230   :  { %6783 = vmatmul.mubr.f32.vlgmr.msra.gmra.mrb[16].mxu1 %v10163_v44  ;;  %6593 = vmatprep.mubr.f32.mxu0 %v8486_v40 }
 0x231   :  { %6785 = vmatprep.mubr.f32.mxu1 %v8468_v37  ;;  %v9231_v37 = vpop.permute.xlu0 %1430  ;;  %v9233_v40 = vpop.permute.xlu1 %1428 }
 0x233   :  { %6594 = vmatmul.mubr.f32.gmra.mrb[18].mxu0 %v8488_v58 }
 0x234   :  { %6786 = vmatmul.mubr.f32.gmra.mrb[18].mxu1 %v10164_v34  ;;  %6596 = vmatprep.mubr.f32.mxu0 %v8543_v35 }
 0x235   :  { %6788 = vmatprep.mubr.f32.mxu1 %v8545_v41  ;;  %v9241_v58 = vpop.permute.xlu0 %1434  ;;  %v7565_v41 = vld [vmem:[#allocation2 + $0x8] sm:$0xff] }
 0x237   :  { %6597 = vmatmul.mubr.f32.gmra.mrb[20].mxu0 %v8556_v54 }
 0x238   :  { %6789 = vmatmul.mubr.f32.gmra.mrb[20].mxu1 %v10166_v55  ;;  %6599 = vmatprep.mubr.f32.mxu0 %v8573_v42  ;;  %v9243_v42 = vpop.permute.xlu1 %1432 }
 0x239   :  { %6791 = vmatprep.mubr.f32.mxu1 %v8611_v10  ;;  %v9269_v31 = vpop.permute.xlu0 %1438 }
 0x23b   :  { %6600 = vmatmul.mubr.f32.gmra.mrb[22].mxu0 %v8613_v26 }
 0x23c   :  { %6792 = vmatmul.mubr.f32.gmra.mrb[22].mxu1 %v8630_v21  ;;  %6602 = vmatprep.mubr.f32.mxu0 %v10167_v47  ;;  %v9271_v36 = vpop.permute.xlu1 %1436 }
 0x23d   :  { %6794 = vmatprep.mubr.f32.mxu1 %v10168_v49 }
 0x23f   :  { %6603 = vmatmul.mubr.f32.gmra.mrb[24].mxu0 %v8768_v6  ;;  %v7566_v6 = vld [vmem:[#allocation2] sm:$0xff] }
 0x240   :  { %6795 = vmatmul.mubr.f32.gmra.mrb[24].mxu1 %v10234_v53  ;;  %6605 = vmatprep.mubr.f32.mxu0 %v10235_v46 }
 0x241   :  { %6797 = vmatprep.mubr.f32.mxu1 %v10236_v22  ;;  %v6208_v21 = vpop.f32.mrb[0].mxu0  ;;  %v6400_v35 = vpop.f32.mrb[0].mxu1 }
 0x242   :  { %v6998_v54 = vadd.f32 %v7565_v41, %v6208_v21  ;;  %v7014_v10 = vadd.f32 %v6400_v35, %v1415_v13  ;;  %v1202_v26 = vpop.f32.mrb[1].mxu0  ;;  %v2544_v8 = vpop.f32.mrb[1].mxu1  ;;  %v7572_v13 = vld [vmem:[#allocation2 + $0x30] sm:$0xff] }
 0x243   :  { %6606 = vmatmul.mubr.f32.gmra.mrb[26].mxu0 %v10237_v29  ;;  %v6999_v44 = vadd.f32 %v7566_v6, %v1202_v26  ;;  %v7015_v34 = vadd.f32 %v2544_v8, %v1413_v24  ;;  %v1443_v22 = vpop.permute.xlu0 %1442  ;;  %v1441_v29 = vpop.permute.xlu1 %1440  ;;  %v7576_v35 = vld [vmem:[#allocation2 + $0x50] sm:$0xff]  ;;  %v7577_v8 = vld [vmem:[#allocation2 + $0x68] sm:$0xff] }
 0x244   :  { %6798 = vmatmul.mubr.f32.gmra.mrb[26].mxu1 %v10238_v56  ;;  %6608 = vmatprep.mubr.f32.mxu0 %v10239_v30  ;;  %1297 = vst.msk [vmem:[%s9667_s3 + $0x8] sm:$0xff] %vm117_vm3, %v6998_v54 }
 0x245   :  { %6800 = vmatprep.mubr.f32.mxu1 %v10240_v12  ;;  %2656 = vrot.lane.b32.xlu0 %v7014_v10, %s7611_s30  ;;  %1296 = vst.msk [vmem:[%s9667_s3] sm:$0xff] %vm117_vm3, %v6999_v44  ;;  %v6403_v55 = vpop.f32.mrb[2].mxu1  ;;  %v6211_v47 = vpop.f32.mrb[2].mxu0  ;;  %v7573_v12 = vld [vmem:[#allocation2 + $0x48] sm:$0xff] }
 0x246   :  { %2654 = vrot.lane.b32.xlu1 %v7015_v34, %s7611_s30  ;;  %v7016_v49 = vadd.f32 %v6403_v55, %v1419_v3  ;;  %v7000_v7 = vadd.f32 %v7567_v61, %v6211_v47  ;;  %v1214_v51 = vpop.f32.mrb[3].mxu0  ;;  %v2556_v33 = vpop.f32.mrb[3].mxu1  ;;  %v7578_v34 = vld [vmem:[#allocation2 + $0x60] sm:$0xff] }
 0x247   :  { %6609 = vmatmul.mubr.f32.gmra.mrb[28].mxu0 %v10241_v16  ;;  %v7001_v2 = vadd.f32 %v7568_v27, %v1214_v51  ;;  %v7017_v39 = vadd.f32 %v2556_v33, %v9197_v28  ;;  %v9313_v24 = vpop.permute.xlu1 %2819  ;;  %v7579_v27 = vld [vmem:[#allocation2 + $0x78] sm:$0xff] }
 0x248   :  { %6801 = vmatmul.mubr.f32.gmra.mrb[28].mxu1 %v10242_v32  ;;  %6611 = vmatprep.mubr.f32.mxu0 %v10243_v60  ;;  %1299 = vst.msk [vmem:[%s9667_s3 + $0x18] sm:$0xff] %vm117_vm3, %v7000_v7 }
 0x249   :  { %6803 = vmatprep.mubr.f32.mxu1 %v10244_v1  ;;  %2660 = vrot.lane.b32.xlu0 %v7016_v49, %s7611_s30  ;;  %1298 = vst.msk [vmem:[%s9667_s3 + $0x10] sm:$0xff] %vm117_vm3, %v7001_v2  ;;  %v6406_v38 = vpop.f32.mrb[4].mxu1  ;;  %v6214_v0 = vpop.f32.mrb[4].mxu0  ;;  %v7574_v1 = vld [vmem:[#allocation2 + $0x40] sm:$0xff] }
 0x24a   :  { %2658 = vrot.lane.b32.xlu1 %v7017_v39, %s7611_s30  ;;  %v7018_v19 = vadd.f32 %v6406_v38, %v9211_v17  ;;  %v7002_v45 = vadd.f32 %v7569_v43, %v6214_v0  ;;  %v1226_v52 = vpop.f32.mrb[5].mxu0  ;;  %v2568_v62 = vpop.f32.mrb[5].mxu1 }
 0x24b   :  { %6612 = vmatmul.mubr.f32.gmra.mrb[30].mxu0 %v10245_v14  ;;  %v7003_v48 = vadd.f32 %v7570_v20, %v1226_v52  ;;  %v7019_v50 = vadd.f32 %v2568_v62, %v9213_v23  ;;  %v9341_v61 = vpop.permute.xlu1 %2823 }
 0x24c   :  { %6804 = vmatmul.mubr.f32.gmra.mrb[30].mxu1 %v10246_v18  ;;  %1301 = vst.msk [vmem:[%s9667_s3 + $0x28] sm:$0xff] %vm117_vm3, %v7002_v45  ;;  %v9311_v18 = vpop.permute.xlu0 %2821 }
 0x24d   :  { %2664 = vrot.lane.b32.xlu0 %v7018_v19, %s7611_s30  ;;  %1300 = vst.msk [vmem:[%s9667_s3 + $0x20] sm:$0xff] %vm117_vm3, %v7003_v48  ;;  %v6409_v5 = vpop.f32.mrb[6].mxu1  ;;  %v6217_v59 = vpop.f32.mrb[6].mxu0 }
 0x24e   :  { %2662 = vrot.lane.b32.xlu1 %v7019_v50, %s7611_s30  ;;  %v7020_v57 = vadd.f32 %v6409_v5, %v9221_v9  ;;  %v7004_v25 = vadd.f32 %v7571_v15, %v6217_v59  ;;  %v1238_v11 = vpop.f32.mrb[7].mxu0  ;;  %v2580_v63 = vpop.f32.mrb[7].mxu1 }
 0x24f   :  { %v7005_v53 = vadd.f32 %v7572_v13, %v1238_v11  ;;  %v7021_v46 = vadd.f32 %v2580_v63, %v9223_v4  ;;  %v7575_v4 = vld [vmem:[#allocation2 + $0x58] sm:$0xff]  ;;  %v9360_v43 = vpop.permute.xlu1 %2827 }
 0x250   :  { %1303 = vst.msk [vmem:[%s9667_s3 + $0x38] sm:$0xff] %vm117_vm3, %v7004_v25  ;;  %v9339_v49 = vpop.permute.xlu0 %2825 }
 0x251   :  { %2668 = vrot.lane.b32.xlu0 %v7020_v57, %s7611_s30  ;;  %1302 = vst.msk [vmem:[%s9667_s3 + $0x30] sm:$0xff] %vm117_vm3, %v7005_v53  ;;  %v6412_v56 = vpop.f32.mrb[8].mxu1  ;;  %v6220_v28 = vpop.f32.mrb[8].mxu0 }
 0x252   :  { %2666 = vrot.lane.b32.xlu1 %v7021_v46, %s7611_s30  ;;  %v7022_v30 = vadd.f32 %v6412_v56, %v9231_v37  ;;  %v7006_v16 = vadd.f32 %v7573_v12, %v6220_v28  ;;  %v1250_v32 = vpop.f32.mrb[9].mxu0  ;;  %v2592_v60 = vpop.f32.mrb[9].mxu1 }
 0x253   :  { %v7007_v3 = vadd.f32 %v7574_v1, %v1250_v32  ;;  %v7023_v14 = vadd.f32 %v2592_v60, %v9233_v40  ;;  %v9364_v52 = vpop.permute.xlu1 %2831 }
 0x254   :  { %1305 = vst.msk [vmem:[%s9667_s3 + $0x48] sm:$0xff] %vm117_vm3, %v7006_v16  ;;  %v9358_v19 = vpop.permute.xlu0 %2829 }
 0x255   :  { %2672 = vrot.lane.b32.xlu0 %v7022_v30, %s7611_s30  ;;  %1304 = vst.msk [vmem:[%s9667_s3 + $0x40] sm:$0xff] %vm117_vm3, %v7007_v3  ;;  %v6415_v17 = vpop.f32.mrb[10].mxu1  ;;  %v6223_v23 = vpop.f32.mrb[10].mxu0 }
 0x256   :  { %2670 = vrot.lane.b32.xlu1 %v7023_v14, %s7611_s30  ;;  %v7024_v9 = vadd.f32 %v6415_v17, %v9241_v58  ;;  %v7008_v37 = vadd.f32 %v7575_v4, %v6223_v23  ;;  %v1262_v40 = vpop.f32.mrb[11].mxu0  ;;  %v2604_v21 = vpop.f32.mrb[11].mxu1 }
 0x257   :  { %v7009_v41 = vadd.f32 %v7576_v35, %v1262_v40  ;;  %v7025_v54 = vadd.f32 %v2604_v21, %v9243_v42  ;;  %v9368_v20 = vpop.permute.xlu1 %2835 }
 0x258   :  { %1307 = vst.msk [vmem:[%s9667_s3 + $0x58] sm:$0xff] %vm117_vm3, %v7008_v37  ;;  %v9362_v45 = vpop.permute.xlu0 %2833 }
 0x259   :  { %2676 = vrot.lane.b32.xlu0 %v7024_v9, %s7611_s30  ;;  %1306 = vst.msk [vmem:[%s9667_s3 + $0x50] sm:$0xff] %vm117_vm3, %v7009_v41  ;;  %v6418_v58 = vpop.f32.mrb[12].mxu1  ;;  %v6226_v10 = vpop.f32.mrb[12].mxu0 }
 0x25a   :  { %2674 = vrot.lane.b32.xlu1 %v7025_v54, %s7611_s30  ;;  %v7026_v26 = vadd.f32 %v6418_v58, %v9269_v31  ;;  %v7010_v42 = vadd.f32 %v7577_v8, %v6226_v10  ;;  %v1274_v6 = vpop.f32.mrb[13].mxu0  ;;  %v2616_v44 = vpop.f32.mrb[13].mxu1 }
 0x25b   :  { %v7011_v55 = vadd.f32 %v7578_v34, %v1274_v6  ;;  %v7027_v47 = vadd.f32 %v2616_v44, %v9271_v36  ;;  %v7580_v36 = vld [vmem:[#allocation2 + $0x70] sm:$0xff]  ;;  %v9372_v50 = vpop.permute.xlu1 %2839 }
 0x25c   :  { %1309 = vst.msk [vmem:[%s9667_s3 + $0x68] sm:$0xff] %vm117_vm3, %v7010_v42  ;;  %v9366_v62 = vpop.permute.xlu0 %2837 }
 0x25d   :  { %2680 = vrot.lane.b32.xlu0 %v7026_v26, %s7611_s30  ;;  %1308 = vst.msk [vmem:[%s9667_s3 + $0x60] sm:$0xff] %vm117_vm3, %v7011_v55  ;;  %v6421_v7 = vpop.f32.mrb[14].mxu1  ;;  %v6229_v51 = vpop.f32.mrb[14].mxu0 }
 0x25e   :  { %2678 = vrot.lane.b32.xlu1 %v7027_v47, %s7611_s30  ;;  %v7028_v33 = vadd.f32 %v6421_v7, %v1443_v22  ;;  %v7012_v2 = vadd.f32 %v7579_v27, %v6229_v51  ;;  %v1286_v39 = vpop.f32.mrb[15].mxu0  ;;  %v2628_v31 = vpop.f32.mrb[15].mxu1 }
 0x25f   :  { %v7013_v38 = vadd.f32 %v7580_v36, %v1286_v39  ;;  %v7029_v0 = vadd.f32 %v2628_v31, %v1441_v29  ;;  %v9376_v59 = vpop.permute.xlu1 %2843 }
 0x260   :  { %1311 = vst.msk [vmem:[%s9667_s3 + $0x78] sm:$0xff] %vm117_vm3, %v7012_v2  ;;  %v9370_v48 = vpop.permute.xlu0 %2841 }
 0x261   :  { %2684 = vrot.lane.b32.xlu0 %v7028_v33, %s7611_s30  ;;  %1310 = vst.msk [vmem:[%s9667_s3 + $0x70] sm:$0xff] %vm117_vm3, %v7013_v38 }
 0x262   :  { %2682 = vrot.lane.b32.xlu1 %v7029_v0, %s7611_s30 }
 0x263   :  { %v9380_v15 = vpop.permute.xlu1 %2847 }
 0x264   :  { %v9374_v5 = vpop.permute.xlu0 %2845 }
 0x267   :  { %v4227_v11 = vpop.permute.xlu1 %4226 }
 0x268   :  { %v9378_v57 = vpop.permute.xlu0 %2849 }
 0x26b   :  { %v9384_v13 = vpop.permute.xlu1 %4230 }
 0x26c   :  { %v4229_v25 = vpop.permute.xlu0 %4228 }
 0x26f   :  { %v9388_v46 = vpop.permute.xlu1 %4234 }
 0x270   :  { %v9382_v63 = vpop.permute.xlu0 %4232 }
 0x273   :  { %v9392_v29 = vpop.permute.xlu1 %4238 }
 0x274   :  { %v9386_v53 = vpop.permute.xlu0 %4236 }
 0x277   :  { %v9396_v28 = vpop.permute.xlu1 %4242 }
 0x278   :  { %v9390_v22 = vpop.permute.xlu0 %4240 }
 0x27b   :  { %v9400_v12 = vpop.permute.xlu1 %4246 }
 0x27c   :  { %v9394_v56 = vpop.permute.xlu0 %4244 }
 0x27f   :  { %v9404_v32 = vpop.permute.xlu1 %4250 }
 0x280   :  { %v9398_v30 = vpop.permute.xlu0 %4248 }
 0x283   :  { %v9408_v1 = vpop.permute.xlu1 %4254 }
 0x284   :  { %v9402_v16 = vpop.permute.xlu0 %4252 }
 0x288   :  { %v9406_v60 = vpop.permute.xlu0 %4256 }
 0x2b7   :  { %v2657_v3 = vpop.permute.xlu0 %2656 }
 0x2b8   :  { %2704 = vst.msk [vmem:[%s9667_s3 + $0x8] sm:$0xff] %vm2702_vm5, %v2657_v3  ;;  %v2655_v14 = vpop.permute.xlu1 %2654 }
 0x2b9   :  { %2703 = vst.msk [vmem:[%s9667_s3] sm:$0xff] %vm2702_vm5, %v2655_v14 }
 0x2bb   :  { %v2661_v17 = vpop.permute.xlu0 %2660 }
 0x2bc   :  { %2706 = vst.msk [vmem:[%s9667_s3 + $0x18] sm:$0xff] %vm2702_vm5, %v2661_v17  ;;  %v2659_v23 = vpop.permute.xlu1 %2658 }
 0x2bd   :  { %2705 = vst.msk [vmem:[%s9667_s3 + $0x10] sm:$0xff] %vm2702_vm5, %v2659_v23 }
 0x2bf   :  { %v2665_v9 = vpop.permute.xlu0 %2664 }
 0x2c0   :  { %2708 = vst.msk [vmem:[%s9667_s3 + $0x28] sm:$0xff] %vm2702_vm5, %v2665_v9  ;;  %v2663_v4 = vpop.permute.xlu1 %2662 }
 0x2c1   :  { %2707 = vst.msk [vmem:[%s9667_s3 + $0x20] sm:$0xff] %vm2702_vm5, %v2663_v4 }
 0x2c3   :  { %v2669_v37 = vpop.permute.xlu0 %2668 }
 0x2c4   :  { %2710 = vst.msk [vmem:[%s9667_s3 + $0x38] sm:$0xff] %vm2702_vm5, %v2669_v37  ;;  %v2667_v40 = vpop.permute.xlu1 %2666 }
 0x2c5   :  { %2709 = vst.msk [vmem:[%s9667_s3 + $0x30] sm:$0xff] %vm2702_vm5, %v2667_v40 }
 0x2c7   :  { %v2673_v21 = vpop.permute.xlu0 %2672 }
 0x2c8   :  { %2712 = vst.msk [vmem:[%s9667_s3 + $0x48] sm:$0xff] %vm2702_vm5, %v2673_v21  ;;  %v2671_v35 = vpop.permute.xlu1 %2670 }
 0x2c9   :  { %2711 = vst.msk [vmem:[%s9667_s3 + $0x40] sm:$0xff] %vm2702_vm5, %v2671_v35 }
 0x2cb   :  { %v2677_v41 = vpop.permute.xlu0 %2676 }
 0x2cc   :  { %2714 = vst.msk [vmem:[%s9667_s3 + $0x58] sm:$0xff] %vm2702_vm5, %v2677_v41  ;;  %v2675_v54 = vpop.permute.xlu1 %2674 }
 0x2cd   :  { %2713 = vst.msk [vmem:[%s9667_s3 + $0x50] sm:$0xff] %vm2702_vm5, %v2675_v54 }
 0x2cf   :  { %v2681_v58 = vpop.permute.xlu0 %2680 }
 0x2d0   :  { %2716 = vst.msk [vmem:[%s9667_s3 + $0x68] sm:$0xff] %vm2702_vm5, %v2681_v58  ;;  %v2679_v10 = vpop.permute.xlu1 %2678 }
 0x2d1   :  { %2715 = vst.msk [vmem:[%s9667_s3 + $0x60] sm:$0xff] %vm2702_vm5, %v2679_v10 }
 0x2d3   :  { %v2685_v26 = vpop.permute.xlu0 %2684 }
 0x2d4   :  { %2718 = vst.msk [vmem:[%s9667_s3 + $0x78] sm:$0xff] %vm2702_vm5, %v2685_v26  ;;  %v2683_v8 = vpop.permute.xlu1 %2682 }
 0x2d5   :  { %2717 = vst.msk [vmem:[%s9667_s3 + $0x70] sm:$0xff] %vm2702_vm5, %v2683_v8 }
 0x302   :  { %v6592_v42 = vpop.f32.mrb[16].mxu0 }
 0x303   :  { %v6784_v6 = vpop.f32.mrb[16].mxu1  ;;  %v7030_v44 = vadd.f32 %v6592_v42, %v9311_v18  ;;  %v3951_v34 = vpop.f32.mrb[17].mxu0 }
 0x304   :  { %v5358_v55 = vpop.f32.mrb[17].mxu1  ;;  %v7031_v47 = vadd.f32 %v3951_v34, %v9313_v24  ;;  %v7046_v33 = vadd.f32 %v6784_v6, %v4229_v25 }
 0x305   :  { %4063 = vrot.lane.b32.xlu0 %v7030_v44, %s7610_s1  ;;  %v7047_v39 = vadd.f32 %v5358_v55, %v4227_v11 }
 0x306   :  { %v6595_v7 = vpop.f32.mrb[18].mxu0  ;;  %4061 = vrot.lane.b32.xlu1 %v7031_v47, %s7610_s1 }
 0x307   :  { %v6787_v51 = vpop.f32.mrb[18].mxu1  ;;  %v3963_v27 = vpop.f32.mrb[19].mxu0  ;;  %v7032_v18 = vadd.f32 %v6595_v7, %v9339_v49 }
 0x308   :  { %v5370_v2 = vpop.f32.mrb[19].mxu1  ;;  %v7033_v0 = vadd.f32 %v3963_v27, %v9341_v61  ;;  %v7048_v25 = vadd.f32 %v6787_v51, %v9382_v63 }
 0x309   :  { %5470 = vrot.lane.b32.xlu0 %v7046_v33, %s7609_s25  ;;  %v7049_v23 = vadd.f32 %v5370_v2, %v9384_v13 }
 0x30a   :  { %v6598_v31 = vpop.f32.mrb[20].mxu0  ;;  %5468 = vrot.lane.b32.xlu1 %v7047_v39, %s7609_s25 }
 0x30b   :  { %v6790_v36 = vpop.f32.mrb[20].mxu1  ;;  %v3975_v38 = vpop.f32.mrb[21].mxu0  ;;  %v7034_v61 = vadd.f32 %v6598_v31, %v9358_v19 }
 0x30c   :  { %v5382_v24 = vpop.f32.mrb[21].mxu1  ;;  %v7035_v40 = vadd.f32 %v3975_v38, %v9360_v43  ;;  %v7050_v13 = vadd.f32 %v6790_v36, %v9386_v53 }
 0x30d   :  { %4067 = vrot.lane.b32.xlu0 %v7032_v18, %s7610_s1  ;;  %v7051_v54 = vadd.f32 %v5382_v24, %v9388_v46 }
 0x30e   :  { %v6601_v3 = vpop.f32.mrb[22].mxu0  ;;  %4065 = vrot.lane.b32.xlu1 %v7033_v0, %s7610_s1 }
 0x30f   :  { %v6793_v14 = vpop.f32.mrb[22].mxu1  ;;  %v3987_v11 = vpop.f32.mrb[23].mxu0  ;;  %v7036_v43 = vadd.f32 %v6601_v3, %v9362_v45 }
 0x310   :  { %v5394_v17 = vpop.f32.mrb[23].mxu1  ;;  %v7037_v8 = vadd.f32 %v3987_v11, %v9364_v52  ;;  %v7052_v46 = vadd.f32 %v6793_v14, %v9390_v22 }
 0x311   :  { %5474 = vrot.lane.b32.xlu0 %v7048_v25, %s7609_s25  ;;  %v7053_v34 = vadd.f32 %v5394_v17, %v9392_v29 }
 0x312   :  { %v6604_v9 = vpop.f32.mrb[24].mxu0  ;;  %5472 = vrot.lane.b32.xlu1 %v7049_v23, %s7609_s25 }
 0x313   :  { %v6796_v49 = vpop.f32.mrb[24].mxu1  ;;  %v3999_v4 = vpop.f32.mrb[25].mxu0  ;;  %v7038_v45 = vadd.f32 %v6604_v9, %v9366_v62 }
 0x314   :  { %v5406_v37 = vpop.f32.mrb[25].mxu1  ;;  %v7039_v52 = vadd.f32 %v3999_v4, %v9368_v20  ;;  %v7054_v55 = vadd.f32 %v6796_v49, %v9394_v56 }
 0x315   :  { %4071 = vrot.lane.b32.xlu0 %v7034_v61, %s7610_s1  ;;  %v7055_v22 = vadd.f32 %v5406_v37, %v9396_v28 }
 0x316   :  { %v6607_v21 = vpop.f32.mrb[26].mxu0  ;;  %4069 = vrot.lane.b32.xlu1 %v7035_v40, %s7610_s1 }
 0x317   :  { %v6799_v63 = vpop.f32.mrb[26].mxu1  ;;  %v4011_v35 = vpop.f32.mrb[27].mxu0  ;;  %v7040_v29 = vadd.f32 %v6607_v21, %v9370_v48 }
 0x318   :  { %v5418_v41 = vpop.f32.mrb[27].mxu1  ;;  %v7041_v47 = vadd.f32 %v4011_v35, %v9372_v50  ;;  %v7056_v62 = vadd.f32 %v6799_v63, %v9398_v30 }
 0x319   :  { %5478 = vrot.lane.b32.xlu0 %v7050_v13, %s7609_s25  ;;  %v7057_v20 = vadd.f32 %v5418_v41, %v9400_v12 }
 0x31a   :  { %v6610_v58 = vpop.f32.mrb[28].mxu0  ;;  %5476 = vrot.lane.b32.xlu1 %v7051_v54, %s7609_s25 }
 0x31b   :  { %v6802_v19 = vpop.f32.mrb[28].mxu1  ;;  %v4023_v10 = vpop.f32.mrb[29].mxu0  ;;  %v7042_v56 = vadd.f32 %v6610_v58, %v9374_v5 }
 0x31c   :  { %v5430_v26 = vpop.f32.mrb[29].mxu1  ;;  %v7043_v28 = vadd.f32 %v4023_v10, %v9376_v59  ;;  %v7058_v48 = vadd.f32 %v6802_v19, %v9402_v16 }
 0x31d   :  { %4075 = vrot.lane.b32.xlu0 %v7036_v43, %s7610_s1  ;;  %v7059_v50 = vadd.f32 %v5430_v26, %v9404_v32 }
 0x31e   :  { %v6613_v42 = vpop.f32.mrb[30].mxu0  ;;  %4073 = vrot.lane.b32.xlu1 %v7037_v8, %s7610_s1 }
 0x31f   :  { %v6805_v53 = vpop.f32.mrb[30].mxu1  ;;  %v4035_v6 = vpop.f32.mrb[31].mxu0  ;;  %v7044_v30 = vadd.f32 %v6613_v42, %v9378_v57 }
 0x320   :  { %v5442_v44 = vpop.f32.mrb[31].mxu1  ;;  %v7045_v12 = vadd.f32 %v4035_v6, %v9380_v15  ;;  %v7060_v5 = vadd.f32 %v6805_v53, %v9406_v60 }
 0x321   :  { %5482 = vrot.lane.b32.xlu0 %v7052_v46, %s7609_s25  ;;  %v7061_v59 = vadd.f32 %v5442_v44, %v9408_v1 }
 0x322   :  { %5480 = vrot.lane.b32.xlu1 %v7053_v34, %s7609_s25 }
 0x325   :  { %4079 = vrot.lane.b32.xlu0 %v7038_v45, %s7610_s1 }
 0x326   :  { %4077 = vrot.lane.b32.xlu1 %v7039_v52, %s7610_s1 }
 0x329   :  { %5486 = vrot.lane.b32.xlu0 %v7054_v55, %s7609_s25 }
 0x32a   :  { %5484 = vrot.lane.b32.xlu1 %v7055_v22, %s7609_s25 }
 0x32d   :  { %4083 = vrot.lane.b32.xlu0 %v7040_v29, %s7610_s1 }
 0x32e   :  { %4081 = vrot.lane.b32.xlu1 %v7041_v47, %s7610_s1 }
 0x331   :  { %5490 = vrot.lane.b32.xlu0 %v7056_v62, %s7609_s25 }
 0x332   :  { %5488 = vrot.lane.b32.xlu1 %v7057_v20, %s7609_s25 }
 0x335   :  { %4087 = vrot.lane.b32.xlu0 %v7042_v56, %s7610_s1 }
 0x336   :  { %4085 = vrot.lane.b32.xlu1 %v7043_v28, %s7610_s1 }
 0x339   :  { %5494 = vrot.lane.b32.xlu0 %v7058_v48, %s7609_s25 }
 0x33a   :  { %5492 = vrot.lane.b32.xlu1 %v7059_v50, %s7609_s25 }
 0x33d   :  { %4091 = vrot.lane.b32.xlu0 %v7044_v30, %s7610_s1 }
 0x33e   :  { %4089 = vrot.lane.b32.xlu1 %v7045_v12, %s7610_s1 }
 0x341   :  { %5498 = vrot.lane.b32.xlu0 %v7060_v5, %s7609_s25 }
 0x342   :  { %5496 = vrot.lane.b32.xlu1 %v7061_v59, %s7609_s25 }
 0x377   :  { %v4064_v16 = vpop.permute.xlu0 %4063 }
 0x378   :  { %4111 = vst.msk [vmem:[%s9667_s3 + $0x8] sm:$0xff] %vm4109_vm8, %v4064_v16  ;;  %v4062_v57 = vpop.permute.xlu1 %4061 }
 0x379   :  { %4110 = vst.msk [vmem:[%s9667_s3] sm:$0xff] %vm4109_vm8, %v4062_v57 }
 0x37b   :  { %v5471_v15 = vpop.permute.xlu0 %5470 }
 0x37c   :  { %5518 = vst.msk [vmem:[%s9667_s3 + $0x8] sm:$0xff] %vm5516_vm6, %v5471_v15  ;;  %v5469_v32 = vpop.permute.xlu1 %5468 }
 0x37d   :  { %5517 = vst.msk [vmem:[%s9667_s3] sm:$0xff] %vm5516_vm6, %v5469_v32 }
 0x37f   :  { %v4068_v60 = vpop.permute.xlu0 %4067 }
 0x380   :  { %4113 = vst.msk [vmem:[%s9667_s3 + $0x18] sm:$0xff] %vm4109_vm8, %v4068_v60  ;;  %v4066_v1 = vpop.permute.xlu1 %4065 }
 0x381   :  { %4112 = vst.msk [vmem:[%s9667_s3 + $0x10] sm:$0xff] %vm4109_vm8, %v4066_v1 }
 0x383   :  { %v5475_v7 = vpop.permute.xlu0 %5474 }
 0x384   :  { %5520 = vst.msk [vmem:[%s9667_s3 + $0x18] sm:$0xff] %vm5516_vm6, %v5475_v7  ;;  %v5473_v51 = vpop.permute.xlu1 %5472 }
 0x385   :  { %5519 = vst.msk [vmem:[%s9667_s3 + $0x10] sm:$0xff] %vm5516_vm6, %v5473_v51 }
 0x387   :  { %v4072_v33 = vpop.permute.xlu0 %4071 }
 0x388   :  { %4115 = vst.msk [vmem:[%s9667_s3 + $0x28] sm:$0xff] %vm4109_vm8, %v4072_v33  ;;  %v4070_v27 = vpop.permute.xlu1 %4069 }
 0x389   :  { %4114 = vst.msk [vmem:[%s9667_s3 + $0x20] sm:$0xff] %vm4109_vm8, %v4070_v27 }
 0x38b   :  { %v5479_v2 = vpop.permute.xlu0 %5478 }
 0x38c   :  { %5522 = vst.msk [vmem:[%s9667_s3 + $0x28] sm:$0xff] %vm5516_vm6, %v5479_v2  ;;  %v5477_v39 = vpop.permute.xlu1 %5476 }
 0x38d   :  { %5521 = vst.msk [vmem:[%s9667_s3 + $0x20] sm:$0xff] %vm5516_vm6, %v5477_v39 }
 0x38f   :  { %v4076_v31 = vpop.permute.xlu0 %4075 }
 0x390   :  { %4117 = vst.msk [vmem:[%s9667_s3 + $0x38] sm:$0xff] %vm4109_vm8, %v4076_v31  ;;  %v4074_v36 = vpop.permute.xlu1 %4073 }
 0x391   :  { %4116 = vst.msk [vmem:[%s9667_s3 + $0x30] sm:$0xff] %vm4109_vm8, %v4074_v36 }
 0x393   :  { %v5483_v18 = vpop.permute.xlu0 %5482 }
 0x394   :  { %5524 = vst.msk [vmem:[%s9667_s3 + $0x38] sm:$0xff] %vm5516_vm6, %v5483_v18  ;;  %v5481_v38 = vpop.permute.xlu1 %5480 }
 0x395   :  { %5523 = vst.msk [vmem:[%s9667_s3 + $0x30] sm:$0xff] %vm5516_vm6, %v5481_v38 }
 0x397   :  { %v4080_v24 = vpop.permute.xlu0 %4079 }
 0x398   :  { %4119 = vst.msk [vmem:[%s9667_s3 + $0x48] sm:$0xff] %vm4109_vm8, %v4080_v24  ;;  %v4078_v0 = vpop.permute.xlu1 %4077 }
 0x399   :  { %4118 = vst.msk [vmem:[%s9667_s3 + $0x40] sm:$0xff] %vm4109_vm8, %v4078_v0 }
 0x39b   :  { %v5487_v3 = vpop.permute.xlu0 %5486 }
 0x39c   :  { %5526 = vst.msk [vmem:[%s9667_s3 + $0x48] sm:$0xff] %vm5516_vm6, %v5487_v3  ;;  %v5485_v14 = vpop.permute.xlu1 %5484 }
 0x39d   :  { %5525 = vst.msk [vmem:[%s9667_s3 + $0x40] sm:$0xff] %vm5516_vm6, %v5485_v14 }
 0x39f   :  { %v4084_v25 = vpop.permute.xlu0 %4083 }
 0x3a0   :  { %4121 = vst.msk [vmem:[%s9667_s3 + $0x58] sm:$0xff] %vm4109_vm8, %v4084_v25  ;;  %v4082_v11 = vpop.permute.xlu1 %4081 }
 0x3a1   :  { %4120 = vst.msk [vmem:[%s9667_s3 + $0x50] sm:$0xff] %vm4109_vm8, %v4082_v11 }
 0x3a3   :  { %v5491_v17 = vpop.permute.xlu0 %5490 }
 0x3a4   :  { %5528 = vst.msk [vmem:[%s9667_s3 + $0x58] sm:$0xff] %vm5516_vm6, %v5491_v17  ;;  %v5489_v23 = vpop.permute.xlu1 %5488 }
 0x3a5   :  { %5527 = vst.msk [vmem:[%s9667_s3 + $0x50] sm:$0xff] %vm5516_vm6, %v5489_v23 }
 0x3a7   :  { %v4088_v9 = vpop.permute.xlu0 %4087 }
 0x3a8   :  { %4123 = vst.msk [vmem:[%s9667_s3 + $0x68] sm:$0xff] %vm4109_vm8, %v4088_v9  ;;  %v4086_v49 = vpop.permute.xlu1 %4085 }
 0x3a9   :  { %4122 = vst.msk [vmem:[%s9667_s3 + $0x60] sm:$0xff] %vm4109_vm8, %v4086_v49 }
 0x3ab   :  { %v5495_v61 = vpop.permute.xlu0 %5494 }
 0x3ac   :  { %5530 = vst.msk [vmem:[%s9667_s3 + $0x68] sm:$0xff] %vm5516_vm6, %v5495_v61  ;;  %v5493_v4 = vpop.permute.xlu1 %5492 }
 0x3ad   :  { %5529 = vst.msk [vmem:[%s9667_s3 + $0x60] sm:$0xff] %vm5516_vm6, %v5493_v4 }
 0x3af   :  { %v4092_v37 = vpop.permute.xlu0 %4091 }
 0x3b0   :  { %4125 = vst.msk [vmem:[%s9667_s3 + $0x78] sm:$0xff] %vm4109_vm8, %v4092_v37  ;;  %v4090_v40 = vpop.permute.xlu1 %4089 }
 0x3b1   :  { %4124 = vst.msk [vmem:[%s9667_s3 + $0x70] sm:$0xff] %vm4109_vm8, %v4090_v40 }
 0x3b3   :  { %v5499_v21 = vpop.permute.xlu0 %5498 }
 0x3b4   :  { %5532 = vst.msk [vmem:[%s9667_s3 + $0x78] sm:$0xff] %vm5516_vm6, %v5499_v21  ;;  %v5497_v63 = vpop.permute.xlu1 %5496 }
 0x3b5   :  { %5531 = vst.msk [vmem:[%s9667_s3 + $0x70] sm:$0xff] %vm5516_vm6, %v5497_v63 }
 0x3b6   :  { %5537 = vsyncpa [#allocation3], 1 }

</bundles_post_ra>
